<compile_context>
chip_gen: v7x
topology: tpu7x:2x2x1
jax: 0.10.0
libtpu: 0.0.40
codegen_flags: <defaults>
</compile_context>

<pallas_src>
import functools

import jax
import jax.numpy as jnp
from jax import lax
from jax.experimental import pallas as pl
from jax.experimental.pallas import tpu as pltpu


def _round_up(n: int, m: int) -> int:
    return (n + m - 1) // m * m


def _sigmoid(v):
    # sigmoid(x) == 0.5*(tanh(x/2)+1): one EUP op (tanh) + cheap VALU ops,
    # instead of exp + reciprocal (two EUP ops).
    return 0.5 * (jnp.tanh(0.5 * v) + 1.0)


def _qlstm_kernel(x_ref, h0_ref, w_ref, b_ref, y_ref, hlast_ref, h_scr, *,
                  seq_len: int, needs_time_mask: bool):
    """One grid step = one (batch tile, time chunk).

    x_ref:     (Lc, BT, Dp)  time-major input chunk
    h0_ref:    (BT, Dp)      initial hidden state for this batch tile
    w_ref:     (Dp, 4*Dp)    fused [forget | input | input_gate | output_gate]
    b_ref:     (1, 4*Dp)     fused bias (f32)
    y_ref:     (Lc, BT, Dp)  output chunk (time-major)
    hlast_ref: (BT, Dp)      final hidden state (written on last chunk only)
    h_scr:     (BT, Dp) f32  hidden-state carry across time chunks
    """
    Lc, BT, Dp = x_ref.shape
    tc = pl.program_id(1)
    n_tc = pl.num_programs(1)

    # ---- init carry from h0 on the first time chunk of this batch tile ----
    @pl.when(tc == 0)
    def _():
        h_scr[...] = h0_ref[...].astype(jnp.float32)

    # ---- fused gate projection: ONE MXU matmul for all four gates ---------
    x2 = x_ref[...].reshape(Lc * BT, Dp)              # layout-free collapse
    gates = jnp.dot(x2, w_ref[...], preferred_element_type=jnp.float32)
    gates = gates + b_ref[...].astype(jnp.float32)

    f = _sigmoid(gates[:, 0 * Dp:1 * Dp]).reshape(Lc, BT, Dp)          # forget
    i = (jnp.tanh(gates[:, 1 * Dp:2 * Dp]) *
         _sigmoid(gates[:, 2 * Dp:3 * Dp])).reshape(Lc, BT, Dp)        # input
    og = _sigmoid(gates[:, 3 * Dp:4 * Dp]).reshape(Lc, BT, Dp)         # out gate

    # ---- sequential recurrence over this chunk (fully unrolled, Lc static) -
    # h_t = f_t * h_{t-1} + i_t, identical to the PyTorch parallel scan plus
    # the hidden * cumprod(forget) correction.
    h = h_scr[...]
    for t in range(Lc):
        f_t = f[t]
        i_t = i[t]
        if needs_time_mask:
            # Padded timesteps (global t >= seq_len): pass h through unchanged.
            valid = (tc * Lc + t) < seq_len
            f_t = jnp.where(valid, f_t, 1.0)
            i_t = jnp.where(valid, i_t, 0.0)
        h = f_t * h + i_t
        y_ref[t] = (jnp.tanh(h) * og[t]).astype(y_ref.dtype)
    h_scr[...] = h

    # ---- emit final hidden state on the last time chunk -------------------
    @pl.when(tc == n_tc - 1)
    def _():
        hlast_ref[...] = h.astype(hlast_ref.dtype)


def qlstm_layer(x, hidden, params, *, batch_tile=16, time_chunk=32,
                use_bf16_matmul=False):
    """x: (B, L, D), hidden: (B, D) -> (y: (B, L, D), h_last: (B, D))."""
    B, L, D = x.shape
    dt = x.dtype

    BT = _round_up(max(int(batch_tile), 8), 8)        # sublane batch tile
    Bp = _round_up(B, BT)                             # padded batch
    Dp = _round_up(D, 128)                            # lane-dense feature dim
    Lc = min(int(time_chunk), L)                      # time chunk per grid step
    Lp = _round_up(L, Lc)                             # padded sequence length
    needs_mask = Lp != L

    mm_dt = jnp.bfloat16 if use_bf16_matmul else dt   # matmul-input dtype

    # Fused, pre-transposed (in, out), zero-padded weights: (Dp, 4*Dp) with
    # column chunks [forget | input | input_gate | output_gate]; bias (1, 4*Dp).
    def pad_w(w):                                     # torch Linear weight: (out, in)
        w = jnp.asarray(w).T.astype(mm_dt)
        if Dp != D:
            w = jnp.pad(w, ((0, Dp - D), (0, Dp - D)))
        return w

    def pad_b(b):
        b = jnp.asarray(b, jnp.float32)
        if Dp != D:
            b = jnp.pad(b, (0, Dp - D))
        return b

    w_cat = jnp.concatenate(
        [pad_w(params["wf"]), pad_w(params["wi"]),
         pad_w(params["wg"]), pad_w(params["wo"])], axis=1)
    b_cat = jnp.concatenate(
        [pad_b(params["bf"]), pad_b(params["bi"]),
         pad_b(params["bg"]), pad_b(params["bo"])])[None, :]

    # Time-major, zero-padded input and initial hidden state (pad skipped when
    # shapes already align).
    x_tm = jnp.transpose(x, (1, 0, 2)).astype(mm_dt)
    if (Lp, Bp, Dp) != (L, B, D):
        x_tm = jnp.pad(x_tm, ((0, Lp - L), (0, Bp - B), (0, Dp - D)))
    h0 = hidden.astype(dt)
    if (Bp, Dp) != (B, D):
        h0 = jnp.pad(h0, ((0, Bp - B), (0, Dp - D)))

    kernel = functools.partial(_qlstm_kernel, seq_len=L,
                               needs_time_mask=needs_mask)

    grid = (Bp // BT, Lp // Lc)   # batch tiles (parallel), time chunks (arbitrary)

    y_tm, h_last = pl.pallas_call(
        kernel,
        out_shape=(
            jax.ShapeDtypeStruct((Lp, Bp, Dp), dt),
            jax.ShapeDtypeStruct((Bp, Dp), dt),
        ),
        grid_spec=pltpu.PrefetchScalarGridSpec(
            num_scalar_prefetch=0,
            grid=grid,
            in_specs=[
                pl.BlockSpec((Lc, BT, Dp), lambda b, tc: (tc, b, 0)),   # x
                pl.BlockSpec((BT, Dp), lambda b, tc: (b, 0)),           # h0
                pl.BlockSpec((Dp, 4 * Dp), lambda b, tc: (0, 0)),       # fused W
                pl.BlockSpec((1, 4 * Dp), lambda b, tc: (0, 0)),        # fused b
            ],
            out_specs=[
                pl.BlockSpec((Lc, BT, Dp), lambda b, tc: (tc, b, 0)),   # y
                pl.BlockSpec((BT, Dp), lambda b, tc: (b, 0)),           # h_last
            ],
            scratch_shapes=[
                pltpu.VMEM((BT, Dp), jnp.float32),   # hidden-state carry
            ],
        ),
        compiler_params=pltpu.CompilerParams(
            dimension_semantics=("parallel", "arbitrary"),
            vmem_limit_bytes=48 * 1024 * 1024),
    )(x_tm, h0, w_cat, b_cat)

    y = jnp.transpose(y_tm[:L, :B, :D], (1, 0, 2))
    return y, h_last[:B, :D]


def qlstm_ref(x, hidden, params):
    """Pure-JAX reference matching the PyTorch forward semantics."""
    def lin(inp, w, b):
        return inp @ w.T + b

    f = jax.nn.sigmoid(lin(x, params["wf"], params["bf"]))
    i = jnp.tanh(lin(x, params["wi"], params["bi"])) * \
        jax.nn.sigmoid(lin(x, params["wg"], params["bg"]))
    og = jax.nn.sigmoid(lin(x, params["wo"], params["bo"]))

    def step(h, fi):
        f_t, i_t = fi
        h_new = f_t * h + i_t
        return h_new, h_new

    h_last, h_seq = lax.scan(
        step, hidden, (jnp.swapaxes(f, 0, 1), jnp.swapaxes(i, 0, 1)))
    h = jnp.swapaxes(h_seq, 0, 1)  # (B, L, D)
    y = jnp.tanh(h) * og
    return y, h_last


def _make_params(key, D):
    keys = jax.random.split(key, 8)
    bound = 1.0 / float(D) ** 0.5  # PyTorch Linear default init range
    return {
        "wf": jax.random.uniform(keys[0], (D, D), jnp.float32, -bound, bound),
        "bf": jax.random.uniform(keys[1], (D,), jnp.float32, -bound, bound),
        "wi": jax.random.uniform(keys[2], (D, D), jnp.float32, -bound, bound),
        "bi": jax.random.uniform(keys[3], (D,), jnp.float32, -bound, bound),
        "wg": jax.random.uniform(keys[4], (D, D), jnp.float32, -bound, bound),
        "bg": jax.random.uniform(keys[5], (D,), jnp.float32, -bound, bound),
        "wo": jax.random.uniform(keys[6], (D, D), jnp.float32, -bound, bound),
        "bo": jax.random.uniform(keys[7], (D,), jnp.float32, -bound, bound),
    }


if __name__ == "__main__":
    key = jax.random.PRNGKey(0)
    kp, kx, kh, kx2, kh2 = jax.random.split(key, 5)

    # --- case 1: small canonical shapes, single time chunk ------------------
    B, L, D = 2, 8, 32
    params = _make_params(kp, D)
    x = jax.random.normal(kx, (B, L, D), jnp.float32)
    hidden = jax.random.normal(kh, (B, D), jnp.float32)

    y, h_last = qlstm_layer(x, hidden, params)
    jax.block_until_ready((y, h_last))
    y_ref_out, h_ref = qlstm_ref(x, hidden, params)
    assert y.shape == (B, L, D) and h_last.shape == (B, D)
    assert jnp.allclose(y, y_ref_out, atol=1e-5, rtol=1e-5)
    assert jnp.allclose(h_last, h_ref, atol=1e-5, rtol=1e-5)

    # --- case 2: exercises time-chunk carry + time padding mask -------------
    B2, L2 = 3, 10
    x2 = jax.random.normal(kx2, (B2, L2, D), jnp.float32)
    hidden2 = jax.random.normal(kh2, (B2, D), jnp.float32)

    y2, h_last2 = qlstm_layer(x2, hidden2, params, batch_tile=8, time_chunk=4)
    jax.block_until_ready((y2, h_last2))
    y2_ref, h2_ref = qlstm_ref(x2, hidden2, params)
    assert jnp.allclose(y2, y2_ref, atol=1e-5, rtol=1e-5)
    assert jnp.allclose(h_last2, h2_ref, atol=1e-5, rtol=1e-5)

    print("KERNEL_OK")
</pallas_src>

<mosaic_0001>
module attributes {stable_mosaic.version = 11 : i64} {
  func.func @_qlstm_kernel(%arg0: i32, %arg1: i32, %arg2: memref<8x16x128xf32, #tpu.memory_space<vmem>>, %arg3: memref<16x128xf32, #tpu.memory_space<vmem>>, %arg4: memref<128x512xf32, #tpu.memory_space<vmem>>, %arg5: memref<1x512xf32, #tpu.memory_space<vmem>>, %arg6: memref<8x16x128xf32, #tpu.memory_space<vmem>>, %arg7: memref<16x128xf32, #tpu.memory_space<vmem>>, %arg8: memref<16x128xf32, #tpu.memory_space<vmem>>) attributes {dimension_semantics = [#tpu.dimension_semantics<parallel>, #tpu.dimension_semantics<arbitrary>], iteration_bounds = array<i64: 1, 1>, scalar_prefetch = 0 : i64, scratch_operands = 1 : i64, tpu.core_type = #tpu.core_type<tc>, window_params = [{transform_indices = @transform_0, window_bounds = array<i64: 8, 16, 128>}, {transform_indices = @transform_1, window_bounds = array<i64: 16, 128>}, {pipeline_mode = #tpu.pipeline_mode<synchronous>, transform_indices = @transform_2, window_bounds = array<i64: 128, 512>}, {pipeline_mode = #tpu.pipeline_mode<synchronous>, transform_indices = @transform_3, window_bounds = array<i64: 1, 512>}, {transform_indices = @transform_4, window_bounds = array<i64: 8, 16, 128>}, {transform_indices = @transform_5, window_bounds = array<i64: 16, 128>}]} {
    %c0_i32 = arith.constant 0 : i32
    %0 = arith.cmpi eq, %arg1, %c0_i32 : i32
    %1 = arith.extui %0 : i1 to i32
    %c0_i32_0 = arith.constant 0 : i32
    %2 = arith.cmpi ne, %1, %c0_i32_0 : i32
    scf.if %2 {
      %c0_39 = arith.constant 0 : index
      %c0_40 = arith.constant 0 : index
      %149 = vector.load %arg3[%c0_39, %c0_40] : memref<16x128xf32, #tpu.memory_space<vmem>>, vector<16x128xf32>
      %c0_41 = arith.constant 0 : index
      %c0_42 = arith.constant 0 : index
      %150 = vector.load %arg8[%c0_41, %c0_42] : memref<16x128xf32, #tpu.memory_space<vmem>>, vector<16x128xf32>
      tpu.vector_store %arg8[%c0_41, %c0_42], %149 {strides = array<i32>} : memref<16x128xf32, #tpu.memory_space<vmem>>, vector<16x128xf32>,
    } else {
    }
    %c0 = arith.constant 0 : index
    %c0_1 = arith.constant 0 : index
    %c0_2 = arith.constant 0 : index
    %3 = vector.load %arg2[%c0, %c0_1, %c0_2] : memref<8x16x128xf32, #tpu.memory_space<vmem>>, vector<8x16x128xf32>
    %4 = vector.shape_cast %3 : vector<8x16x128xf32> to vector<128x128xf32>
    %c0_3 = arith.constant 0 : index
    %c0_4 = arith.constant 0 : index
    %5 = vector.load %arg4[%c0_3, %c0_4] : memref<128x512xf32, #tpu.memory_space<vmem>>, vector<128x512xf32>
    %cst = arith.constant dense<0.000000e+00> : vector<128x512xf32>
    %6 = tpu.matmul %4, %5, %cst {dimension_numbers = #tpu.dot_dimension_numbers<[1], [0], [0], [1], [0, 0, 1, 1], [], []>} : vector<128x128xf32>, vector<128x512xf32>, vector<128x512xf32> -> vector<128x512xf32>
    %c0_5 = arith.constant 0 : index
    %c0_6 = arith.constant 0 : index
    %7 = vector.load %arg5[%c0_5, %c0_6] : memref<1x512xf32, #tpu.memory_space<vmem>>, vector<1x512xf32>
    %8 = vector.broadcast %7 : vector<1x512xf32> to vector<128x512xf32>
    %9 = arith.addf %6, %8 : vector<128x512xf32>
    %10 = vector.extract_strided_slice %9 {offsets = [0, 0], sizes = [128, 128], strides = [1, 1]} : vector<128x512xf32> to vector<128x128xf32>
    %cst_7 = arith.constant 5.000000e-01 : f32
    %11 = vector.broadcast %cst_7 : f32 to vector<128x128xf32>
    %12 = arith.mulf %11, %10 : vector<128x128xf32>
    %13 = math.tanh %12 : vector<128x128xf32>
    %cst_8 = arith.constant 1.000000e+00 : f32
    %14 = vector.broadcast %cst_8 : f32 to vector<128x128xf32>
    %15 = arith.addf %13, %14 : vector<128x128xf32>
    %cst_9 = arith.constant 5.000000e-01 : f32
    %16 = vector.broadcast %cst_9 : f32 to vector<128x128xf32>
    %17 = arith.mulf %16, %15 : vector<128x128xf32>
    %18 = vector.shape_cast %17 : vector<128x128xf32> to vector<8x16x128xf32>
    %19 = vector.extract_strided_slice %9 {offsets = [0, 128], sizes = [128, 128], strides = [1, 1]} : vector<128x512xf32> to vector<128x128xf32>
    %20 = math.tanh %19 : vector<128x128xf32>
    %21 = vector.extract_strided_slice %9 {offsets = [0, 256], sizes = [128, 128], strides = [1, 1]} : vector<128x512xf32> to vector<128x128xf32>
    %cst_10 = arith.constant 5.000000e-01 : f32
    %22 = vector.broadcast %cst_10 : f32 to vector<128x128xf32>
    %23 = arith.mulf %22, %21 : vector<128x128xf32>
    %24 = math.tanh %23 : vector<128x128xf32>
    %cst_11 = arith.constant 1.000000e+00 : f32
    %25 = vector.broadcast %cst_11 : f32 to vector<128x128xf32>
    %26 = arith.addf %24, %25 : vector<128x128xf32>
    %cst_12 = arith.constant 5.000000e-01 : f32
    %27 = vector.broadcast %cst_12 : f32 to vector<128x128xf32>
    %28 = arith.mulf %27, %26 : vector<128x128xf32>
    %29 = arith.mulf %20, %28 : vector<128x128xf32>
    %30 = vector.shape_cast %29 : vector<128x128xf32> to vector<8x16x128xf32>
    %31 = vector.extract_strided_slice %9 {offsets = [0, 384], sizes = [128, 128], strides = [1, 1]} : vector<128x512xf32> to vector<128x128xf32>
    %cst_13 = arith.constant 5.000000e-01 : f32
    %32 = vector.broadcast %cst_13 : f32 to vector<128x128xf32>
    %33 = arith.mulf %32, %31 : vector<128x128xf32>
    %34 = math.tanh %33 : vector<128x128xf32>
    %cst_14 = arith.constant 1.000000e+00 : f32
    %35 = vector.broadcast %cst_14 : f32 to vector<128x128xf32>
    %36 = arith.addf %34, %35 : vector<128x128xf32>
    %cst_15 = arith.constant 5.000000e-01 : f32
    %37 = vector.broadcast %cst_15 : f32 to vector<128x128xf32>
    %38 = arith.mulf %37, %36 : vector<128x128xf32>
    %39 = vector.shape_cast %38 : vector<128x128xf32> to vector<8x16x128xf32>
    %c0_16 = arith.constant 0 : index
    %c0_17 = arith.constant 0 : index
    %40 = vector.load %arg8[%c0_16, %c0_17] : memref<16x128xf32, #tpu.memory_space<vmem>>, vector<16x128xf32>
    %41 = vector.extract_strided_slice %18 {offsets = [0, 0, 0], sizes = [1, 16, 128], strides = [1, 1, 1]} : vector<8x16x128xf32> to vector<1x16x128xf32>
    %42 = vector.shape_cast %41 : vector<1x16x128xf32> to vector<16x128xf32>
    %43 = vector.extract_strided_slice %30 {offsets = [0, 0, 0], sizes = [1, 16, 128], strides = [1, 1, 1]} : vector<8x16x128xf32> to vector<1x16x128xf32>
    %44 = vector.shape_cast %43 : vector<1x16x128xf32> to vector<16x128xf32>
    %45 = arith.mulf %42, %40 : vector<16x128xf32>
    %46 = arith.addf %45, %44 : vector<16x128xf32>
    %47 = math.tanh %46 : vector<16x128xf32>
    %48 = vector.extract_strided_slice %39 {offsets = [0, 0, 0], sizes = [1, 16, 128], strides = [1, 1, 1]} : vector<8x16x128xf32> to vector<1x16x128xf32>
    %49 = vector.shape_cast %48 : vector<1x16x128xf32> to vector<16x128xf32>
    %50 = arith.mulf %47, %49 : vector<16x128xf32>
    %c0_18 = arith.constant 0 : index
    %c0_19 = arith.constant 0 : index
    %c0_20 = arith.constant 0 : index
    %51 = vector.load %arg6[%c0_18, %c0_19, %c0_20] : memref<8x16x128xf32, #tpu.memory_space<vmem>>, vector<1x16x128xf32>
    %52 = vector.shape_cast %51 : vector<1x16x128xf32> to vector<16x128xf32>
    %53 = vector.shape_cast %50 : vector<16x128xf32> to vector<1x16x128xf32>
    tpu.vector_store %arg6[%c0_18, %c0_19, %c0_20], %53 {strides = array<i32>} : memref<8x16x128xf32, #tpu.memory_space<vmem>>, vector<1x16x128xf32>,
    %54 = vector.extract_strided_slice %18 {offsets = [1, 0, 0], sizes = [1, 16, 128], strides = [1, 1, 1]} : vector<8x16x128xf32> to vector<1x16x128xf32>
    %55 = vector.shape_cast %54 : vector<1x16x128xf32> to vector<16x128xf32>
    %56 = vector.extract_strided_slice %30 {offsets = [1, 0, 0], sizes = [1, 16, 128], strides = [1, 1, 1]} : vector<8x16x128xf32> to vector<1x16x128xf32>
    %57 = vector.shape_cast %56 : vector<1x16x128xf32> to vector<16x128xf32>
    %58 = arith.mulf %55, %46 : vector<16x128xf32>
    %59 = arith.addf %58, %57 : vector<16x128xf32>
    %60 = math.tanh %59 : vector<16x128xf32>
    %61 = vector.extract_strided_slice %39 {offsets = [1, 0, 0], sizes = [1, 16, 128], strides = [1, 1, 1]} : vector<8x16x128xf32> to vector<1x16x128xf32>
    %62 = vector.shape_cast %61 : vector<1x16x128xf32> to vector<16x128xf32>
    %63 = arith.mulf %60, %62 : vector<16x128xf32>
    %c1 = arith.constant 1 : index
    %c0_21 = arith.constant 0 : index
    %c0_22 = arith.constant 0 : index
    %64 = vector.load %arg6[%c1, %c0_21, %c0_22] : memref<8x16x128xf32, #tpu.memory_space<vmem>>, vector<1x16x128xf32>
    %65 = vector.shape_cast %64 : vector<1x16x128xf32> to vector<16x128xf32>
    %66 = vector.shape_cast %63 : vector<16x128xf32> to vector<1x16x128xf32>
    tpu.vector_store %arg6[%c1, %c0_21, %c0_22], %66 {strides = array<i32>} : memref<8x16x128xf32, #tpu.memory_space<vmem>>, vector<1x16x128xf32>,
    %67 = vector.extract_strided_slice %18 {offsets = [2, 0, 0], sizes = [1, 16, 128], strides = [1, 1, 1]} : vector<8x16x128xf32> to vector<1x16x128xf32>
    %68 = vector.shape_cast %67 : vector<1x16x128xf32> to vector<16x128xf32>
    %69 = vector.extract_strided_slice %30 {offsets = [2, 0, 0], sizes = [1, 16, 128], strides = [1, 1, 1]} : vector<8x16x128xf32> to vector<1x16x128xf32>
    %70 = vector.shape_cast %69 : vector<1x16x128xf32> to vector<16x128xf32>
    %71 = arith.mulf %68, %59 : vector<16x128xf32>
    %72 = arith.addf %71, %70 : vector<16x128xf32>
    %73 = math.tanh %72 : vector<16x128xf32>
    %74 = vector.extract_strided_slice %39 {offsets = [2, 0, 0], sizes = [1, 16, 128], strides = [1, 1, 1]} : vector<8x16x128xf32> to vector<1x16x128xf32>
    %75 = vector.shape_cast %74 : vector<1x16x128xf32> to vector<16x128xf32>
    %76 = arith.mulf %73, %75 : vector<16x128xf32>
    %c2 = arith.constant 2 : index
    %c0_23 = arith.constant 0 : index
    %c0_24 = arith.constant 0 : index
    %77 = vector.load %arg6[%c2, %c0_23, %c0_24] : memref<8x16x128xf32, #tpu.memory_space<vmem>>, vector<1x16x128xf32>
    %78 = vector.shape_cast %77 : vector<1x16x128xf32> to vector<16x128xf32>
    %79 = vector.shape_cast %76 : vector<16x128xf32> to vector<1x16x128xf32>
    tpu.vector_store %arg6[%c2, %c0_23, %c0_24], %79 {strides = array<i32>} : memref<8x16x128xf32, #tpu.memory_space<vmem>>, vector<1x16x128xf32>,
    %80 = vector.extract_strided_slice %18 {offsets = [3, 0, 0], sizes = [1, 16, 128], strides = [1, 1, 1]} : vector<8x16x128xf32> to vector<1x16x128xf32>
    %81 = vector.shape_cast %80 : vector<1x16x128xf32> to vector<16x128xf32>
    %82 = vector.extract_strided_slice %30 {offsets = [3, 0, 0], sizes = [1, 16, 128], strides = [1, 1, 1]} : vector<8x16x128xf32> to vector<1x16x128xf32>
    %83 = vector.shape_cast %82 : vector<1x16x128xf32> to vector<16x128xf32>
    %84 = arith.mulf %81, %72 : vector<16x128xf32>
    %85 = arith.addf %84, %83 : vector<16x128xf32>
    %86 = math.tanh %85 : vector<16x128xf32>
    %87 = vector.extract_strided_slice %39 {offsets = [3, 0, 0], sizes = [1, 16, 128], strides = [1, 1, 1]} : vector<8x16x128xf32> to vector<1x16x128xf32>
    %88 = vector.shape_cast %87 : vector<1x16x128xf32> to vector<16x128xf32>
    %89 = arith.mulf %86, %88 : vector<16x128xf32>
    %c3 = arith.constant 3 : index
    %c0_25 = arith.constant 0 : index
    %c0_26 = arith.constant 0 : index
    %90 = vector.load %arg6[%c3, %c0_25, %c0_26] : memref<8x16x128xf32, #tpu.memory_space<vmem>>, vector<1x16x128xf32>
    %91 = vector.shape_cast %90 : vector<1x16x128xf32> to vector<16x128xf32>
    %92 = vector.shape_cast %89 : vector<16x128xf32> to vector<1x16x128xf32>
    tpu.vector_store %arg6[%c3, %c0_25, %c0_26], %92 {strides = array<i32>} : memref<8x16x128xf32, #tpu.memory_space<vmem>>, vector<1x16x128xf32>,
    %93 = vector.extract_strided_slice %18 {offsets = [4, 0, 0], sizes = [1, 16, 128], strides = [1, 1, 1]} : vector<8x16x128xf32> to vector<1x16x128xf32>
    %94 = vector.shape_cast %93 : vector<1x16x128xf32> to vector<16x128xf32>
    %95 = vector.extract_strided_slice %30 {offsets = [4, 0, 0], sizes = [1, 16, 128], strides = [1, 1, 1]} : vector<8x16x128xf32> to vector<1x16x128xf32>
    %96 = vector.shape_cast %95 : vector<1x16x128xf32> to vector<16x128xf32>
    %97 = arith.mulf %94, %85 : vector<16x128xf32>
    %98 = arith.addf %97, %96 : vector<16x128xf32>
    %99 = math.tanh %98 : vector<16x128xf32>
    %100 = vector.extract_strided_slice %39 {offsets = [4, 0, 0], sizes = [1, 16, 128], strides = [1, 1, 1]} : vector<8x16x128xf32> to vector<1x16x128xf32>
    %101 = vector.shape_cast %100 : vector<1x16x128xf32> to vector<16x128xf32>
    %102 = arith.mulf %99, %101 : vector<16x128xf32>
    %c4 = arith.constant 4 : index
    %c0_27 = arith.constant 0 : index
    %c0_28 = arith.constant 0 : index
    %103 = vector.load %arg6[%c4, %c0_27, %c0_28] : memref<8x16x128xf32, #tpu.memory_space<vmem>>, vector<1x16x128xf32>
    %104 = vector.shape_cast %103 : vector<1x16x128xf32> to vector<16x128xf32>
    %105 = vector.shape_cast %102 : vector<16x128xf32> to vector<1x16x128xf32>
    tpu.vector_store %arg6[%c4, %c0_27, %c0_28], %105 {strides = array<i32>} : memref<8x16x128xf32, #tpu.memory_space<vmem>>, vector<1x16x128xf32>,
    %106 = vector.extract_strided_slice %18 {offsets = [5, 0, 0], sizes = [1, 16, 128], strides = [1, 1, 1]} : vector<8x16x128xf32> to vector<1x16x128xf32>
    %107 = vector.shape_cast %106 : vector<1x16x128xf32> to vector<16x128xf32>
    %108 = vector.extract_strided_slice %30 {offsets = [5, 0, 0], sizes = [1, 16, 128], strides = [1, 1, 1]} : vector<8x16x128xf32> to vector<1x16x128xf32>
    %109 = vector.shape_cast %108 : vector<1x16x128xf32> to vector<16x128xf32>
    %110 = arith.mulf %107, %98 : vector<16x128xf32>
    %111 = arith.addf %110, %109 : vector<16x128xf32>
    %112 = math.tanh %111 : vector<16x128xf32>
    %113 = vector.extract_strided_slice %39 {offsets = [5, 0, 0], sizes = [1, 16, 128], strides = [1, 1, 1]} : vector<8x16x128xf32> to vector<1x16x128xf32>
    %114 = vector.shape_cast %113 : vector<1x16x128xf32> to vector<16x128xf32>
    %115 = arith.mulf %112, %114 : vector<16x128xf32>
    %c5 = arith.constant 5 : index
    %c0_29 = arith.constant 0 : index
    %c0_30 = arith.constant 0 : index
    %116 = vector.load %arg6[%c5, %c0_29, %c0_30] : memref<8x16x128xf32, #tpu.memory_space<vmem>>, vector<1x16x128xf32>
    %117 = vector.shape_cast %116 : vector<1x16x128xf32> to vector<16x128xf32>
    %118 = vector.shape_cast %115 : vector<16x128xf32> to vector<1x16x128xf32>
    tpu.vector_store %arg6[%c5, %c0_29, %c0_30], %118 {strides = array<i32>} : memref<8x16x128xf32, #tpu.memory_space<vmem>>, vector<1x16x128xf32>,
    %119 = vector.extract_strided_slice %18 {offsets = [6, 0, 0], sizes = [1, 16, 128], strides = [1, 1, 1]} : vector<8x16x128xf32> to vector<1x16x128xf32>
    %120 = vector.shape_cast %119 : vector<1x16x128xf32> to vector<16x128xf32>
    %121 = vector.extract_strided_slice %30 {offsets = [6, 0, 0], sizes = [1, 16, 128], strides = [1, 1, 1]} : vector<8x16x128xf32> to vector<1x16x128xf32>
    %122 = vector.shape_cast %121 : vector<1x16x128xf32> to vector<16x128xf32>
    %123 = arith.mulf %120, %111 : vector<16x128xf32>
    %124 = arith.addf %123, %122 : vector<16x128xf32>
    %125 = math.tanh %124 : vector<16x128xf32>
    %126 = vector.extract_strided_slice %39 {offsets = [6, 0, 0], sizes = [1, 16, 128], strides = [1, 1, 1]} : vector<8x16x128xf32> to vector<1x16x128xf32>
    %127 = vector.shape_cast %126 : vector<1x16x128xf32> to vector<16x128xf32>
    %128 = arith.mulf %125, %127 : vector<16x128xf32>
    %c6 = arith.constant 6 : index
    %c0_31 = arith.constant 0 : index
    %c0_32 = arith.constant 0 : index
    %129 = vector.load %arg6[%c6, %c0_31, %c0_32] : memref<8x16x128xf32, #tpu.memory_space<vmem>>, vector<1x16x128xf32>
    %130 = vector.shape_cast %129 : vector<1x16x128xf32> to vector<16x128xf32>
    %131 = vector.shape_cast %128 : vector<16x128xf32> to vector<1x16x128xf32>
    tpu.vector_store %arg6[%c6, %c0_31, %c0_32], %131 {strides = array<i32>} : memref<8x16x128xf32, #tpu.memory_space<vmem>>, vector<1x16x128xf32>,
    %132 = vector.extract_strided_slice %18 {offsets = [7, 0, 0], sizes = [1, 16, 128], strides = [1, 1, 1]} : vector<8x16x128xf32> to vector<1x16x128xf32>
    %133 = vector.shape_cast %132 : vector<1x16x128xf32> to vector<16x128xf32>
    %134 = vector.extract_strided_slice %30 {offsets = [7, 0, 0], sizes = [1, 16, 128], strides = [1, 1, 1]} : vector<8x16x128xf32> to vector<1x16x128xf32>
    %135 = vector.shape_cast %134 : vector<1x16x128xf32> to vector<16x128xf32>
    %136 = arith.mulf %133, %124 : vector<16x128xf32>
    %137 = arith.addf %136, %135 : vector<16x128xf32>
    %138 = math.tanh %137 : vector<16x128xf32>
    %139 = vector.extract_strided_slice %39 {offsets = [7, 0, 0], sizes = [1, 16, 128], strides = [1, 1, 1]} : vector<8x16x128xf32> to vector<1x16x128xf32>
    %140 = vector.shape_cast %139 : vector<1x16x128xf32> to vector<16x128xf32>
    %141 = arith.mulf %138, %140 : vector<16x128xf32>
    %c7 = arith.constant 7 : index
    %c0_33 = arith.constant 0 : index
    %c0_34 = arith.constant 0 : index
    %142 = vector.load %arg6[%c7, %c0_33, %c0_34] : memref<8x16x128xf32, #tpu.memory_space<vmem>>, vector<1x16x128xf32>
    %143 = vector.shape_cast %142 : vector<1x16x128xf32> to vector<16x128xf32>
    %144 = vector.shape_cast %141 : vector<16x128xf32> to vector<1x16x128xf32>
    tpu.vector_store %arg6[%c7, %c0_33, %c0_34], %144 {strides = array<i32>} : memref<8x16x128xf32, #tpu.memory_space<vmem>>, vector<1x16x128xf32>,
    %c0_35 = arith.constant 0 : index
    %c0_36 = arith.constant 0 : index
    %145 = vector.load %arg8[%c0_35, %c0_36] : memref<16x128xf32, #tpu.memory_space<vmem>>, vector<16x128xf32>
    tpu.vector_store %arg8[%c0_35, %c0_36], %137 {strides = array<i32>} : memref<16x128xf32, #tpu.memory_space<vmem>>, vector<16x128xf32>,
    %c0_i32_37 = arith.constant 0 : i32
    %146 = arith.cmpi eq, %arg1, %c0_i32_37 : i32
    %147 = arith.extui %146 : i1 to i32
    %c0_i32_38 = arith.constant 0 : i32
    %148 = arith.cmpi ne, %147, %c0_i32_38 : i32
    scf.if %148 {
      %c0_39 = arith.constant 0 : index
      %c0_40 = arith.constant 0 : index
      %149 = vector.load %arg7[%c0_39, %c0_40] : memref<16x128xf32, #tpu.memory_space<vmem>>, vector<16x128xf32>
      tpu.vector_store %arg7[%c0_39, %c0_40], %137 {strides = array<i32>} : memref<16x128xf32, #tpu.memory_space<vmem>>, vector<16x128xf32>,
    } else {
    }
    return
  }
  func.func @transform_0(%arg0: i32, %arg1: i32) -> (i32, i32, i32) {
    %c0_i32 = arith.constant 0 : i32
    %c0_i32_0 = arith.constant 0 : i32
    return %arg1, %arg0, %c0_i32 : i32, i32, i32
  }
  func.func @transform_1(%arg0: i32, %arg1: i32) -> (i32, i32) {
    %c0_i32 = arith.constant 0 : i32
    %c0_i32_0 = arith.constant 0 : i32
    return %arg0, %c0_i32 : i32, i32
  }
  func.func @transform_2(%arg0: i32, %arg1: i32) -> (i32, i32) {
    %c0_i32 = arith.constant 0 : i32
    %c0_i32_0 = arith.constant 0 : i32
    %c0_i32_1 = arith.constant 0 : i32
    return %c0_i32, %c0_i32_0 : i32, i32
  }
  func.func @transform_3(%arg0: i32, %arg1: i32) -> (i32, i32) {
    %c0_i32 = arith.constant 0 : i32
    %c0_i32_0 = arith.constant 0 : i32
    %c0_i32_1 = arith.constant 0 : i32
    return %c0_i32, %c0_i32_0 : i32, i32
  }
  func.func @transform_4(%arg0: i32, %arg1: i32) -> (i32, i32, i32) {
    %c0_i32 = arith.constant 0 : i32
    %c0_i32_0 = arith.constant 0 : i32
    return %arg1, %arg0, %c0_i32 : i32, i32, i32
  }
  func.func @transform_5(%arg0: i32, %arg1: i32) -> (i32, i32) {
    %c0_i32 = arith.constant 0 : i32
    %c0_i32_0 = arith.constant 0 : i32
    return %arg0, %c0_i32 : i32, i32
  }
}

</mosaic_0001>

<bundles_post_ra>
// kernel: tpu_custom_call.1
= control target key start
LH: loop header
LB: loop body
LE: loop exit
PB: predicated region body
PF: predicated region fallthrough
CT: control target
= control target key end

     0   :  { %11 = vsyncpa [#allocation4], 0  ;;  %s1508_s0 = inlined_call_operand.hbm [shape: f32[8,16,128], index: 0, kind: input, shape index: {}]   ;;  %s1509_s1 = inlined_call_operand.hbm [shape: f32[16,128], index: 1, kind: input, shape index: {}]   ;;  %s1510_s2 = inlined_call_operand.hbm [shape: f32[128,512], index: 2, kind: input, shape index: {}]   ;;  %s1511_s3 = inlined_call_operand.vmem [shape: f32[1,512], index: 3, kind: input, shape index: {}]   ;;  %s1512_s4 = inlined_call_operand.hbm [shape: f32[8,16,128], index: 4, kind: output, shape index: {0}]   ;;  %s1513_s5 = inlined_call_operand.hbm [shape: f32[16,128], index: 5, kind: output, shape index: {1}]  }
   0x1   :  { %12 = vsyncpa [#allocation7], 0 }
   0x2   :  { %13 = vsyncpa [#allocation5], 0 }
   0x3   :  { %14 = vsyncpa [#allocation11], 0  ;;  %s1200_s18 = smov [#allocation6]   ;;  %s1201_s20 = smov [#allocation3]  }
   0x4   :  { %s32_s19 = sshll.u32 %s1200_s18, 4  ;;  %s20_s21 = sshll.u32 %s1201_s20, 4  ;;  %s33_s19 = int_to_ptr.vmem [resolvable:$true] %s32_s19  ;;  %s1240_s21 = int_to_ptr.vmem [resolvable:$true] %s20_s21 }
   0x5   :  { %s1082_s24 = scalar_lea.hbm %s1509_s1, 256 }
   0x6   :  { %p1083_p0 = scmp.ne.s32.totalorder %s1509_s1, %s1082_s24  ;;  %p1086_p1 = scmp.lt.u32.totalorder %s1082_s24, %s1509_s1 }
   0x8   :  { %p1088_p2 = pnand %p1086_p1, %p1083_p0 }
   0xa   :  { %1091 = shalt.err (!%p1088_p2)
}
   0xb   :  { %s1092_s29 = scalar_lea.vmem %s33_s19, 256  ;;  %p1097_p4 = scmp.lt.s32.totalorder %s33_s19, %s33_s19 }
   0xc   :  { %p1093_p3 = scmp.ne.s32.totalorder %s33_s19, %s1092_s29  ;;  %p1098_p5 = scmp.lt.s32.totalorder %s1092_s29, %s1092_s29 }
   0xe   :  { %p1099_p6 = por %p1098_p5, %p1097_p4 }
  0x10   :  { %p1100_p7 = pnand %p1099_p6, %p1093_p3 }
  0x12   :  { %1103 = shalt.err (!%p1100_p7)
}
  0x13   :  { %s1202_s30 = smov 128   ;;  %s1203_s6 = smov 8  }
  0x14   :  { %38 = dma.hbm_to_vmem [thread:$0]  %s1509_s1, 256, %s33_s19, [#allocation7], %s1202_s30, %s1202_s30, %s1203_s6  }
  0x15   :  { %s1104_s11 = scalar_lea.hbm %s1508_s0, 2048 }
  0x16   :  { %p1105_p8 = scmp.ne.s32.totalorder %s1508_s0, %s1104_s11  ;;  %p1108_p9 = scmp.lt.u32.totalorder %s1104_s11, %s1508_s0 }
  0x18   :  { %p1110_p10 = pnand %p1108_p9, %p1105_p8 }
  0x1a   :  { %1113 = shalt.err (!%p1110_p10)
}
  0x1b   :  { %s1114_s16 = scalar_lea.vmem %s1240_s21, 2048  ;;  %p1119_p12 = scmp.lt.s32.totalorder %s1240_s21, %s1240_s21 }
  0x1c   :  { %p1115_p11 = scmp.ne.s32.totalorder %s1240_s21, %s1114_s16  ;;  %p1120_p13 = scmp.lt.s32.totalorder %s1114_s16, %s1114_s16 }
  0x1e   :  { %p1121_p0 = por %p1120_p13, %p1119_p12 }
  0x20   :  { %p1122_p1 = pnand %p1121_p0, %p1115_p11 }
  0x22   :  { %1125 = shalt.err (!%p1122_p1)
}
  0x23   :  { %26 = dma.hbm_to_vmem [thread:$0]  %s1508_s0, 2048, %s1240_s21, [#allocation4], %s1202_s30, %s1202_s30, %s1203_s6  }
  0x24   :  { %s1204_s18 = smov [#allocation8]   ;;  %s1126_s23 = scalar_lea.hbm %s1510_s2, 8192 }
  0x25   :  { %s44_s19 = sshll.u32 %s1204_s18, 4  ;;  %p1127_p2 = scmp.ne.s32.totalorder %s1510_s2, %s1126_s23  ;;  %s45_s19 = int_to_ptr.vmem [resolvable:$true] %s44_s19 }
  0x26   :  { %p1130_p3 = scmp.lt.u32.totalorder %s1126_s23, %s1510_s2 }
  0x28   :  { %p1132_p4 = pnand %p1130_p3, %p1127_p2 }
  0x2a   :  { %1135 = shalt.err (!%p1132_p4)
}
  0x2b   :  { %s1136_s28 = scalar_lea.vmem %s45_s19, 8192  ;;  %p1141_p6 = scmp.lt.s32.totalorder %s45_s19, %s45_s19 }
  0x2c   :  { %p1137_p5 = scmp.ne.s32.totalorder %s45_s19, %s1136_s28  ;;  %p1142_p7 = scmp.lt.s32.totalorder %s1136_s28, %s1136_s28 }
  0x2e   :  { %p1143_p8 = por %p1142_p7, %p1141_p6 }
  0x30   :  { %p1144_p9 = pnand %p1143_p8, %p1137_p5 }
  0x32   :  { %1147 = shalt.err (!%p1144_p9)
}
  0x33   :  { %s1205_s0 = smov 512   ;;  %s1206_s21 = smov 32  }
  0x34   :  { %50 = dma.hbm_to_vmem [thread:$0]  %s1510_s2, 8192, %s45_s19, [#allocation7], %s1205_s0, %s1205_s0, %s1206_s21  }
  0x35   :  { %1192 = dma.done.wait [#allocation4], 2048  }
  0x36   :  { %1193 = vsyncadd [#allocation4], 4294965248 }
  0x37   :  { %1194 = dma.done.wait [#allocation7], 8448  }
  0x38   :  { %1195 = vsyncadd [#allocation7], 4294958848  ;;  %v1207_v0 = vmov 0.0   ;;  %v87_v1 = vld [vmem:[#allocation8 + $0x8] sm:$0xff]  ;;  %v89_v3 = vld [vmem:[#allocation8 + $0x18] sm:$0xff] }
  0x39   :  { %236 = vmatprep.mubr.f32.mxu0 %v1207_v0  ;;  %397 = vmatprep.mubr.f32.mxu1 %v1207_v0  ;;  %v91_v2 = vld [vmem:[#allocation8 + $0x28] sm:$0xff]  ;;  %v93_v5 = vld [vmem:[#allocation8 + $0x38] sm:$0xff]  ;;  %v86_v6 = vld [vmem:[#allocation8] sm:$0xff] }
  0x3a   :  { %v848_v4 = vpack.c.bf16 %v91_v2, %v87_v1  ;;  %v90_v7 = vld [vmem:[#allocation8 + $0x20] sm:$0xff]  ;;  %v880_v8 = vpack.c.bf16 %v93_v5, %v89_v3  ;;  %v88_v10 = vld [vmem:[#allocation8 + $0x10] sm:$0xff]  ;;  %v95_v12 = vld [vmem:[#allocation8 + $0x48] sm:$0xff] }
  0x3b   :  { %v850_v9 = vpack.c.bf16 %v90_v7, %v86_v6  ;;  %v92_v11 = vld [vmem:[#allocation8 + $0x30] sm:$0xff]  ;;  %v99_v14 = vld [vmem:[#allocation8 + $0x68] sm:$0xff]  ;;  %v97_v15 = vld [vmem:[#allocation8 + $0x58] sm:$0xff] }
  0x3c   :  { %849 = vmatprep.subr.bf16.mxu0 %v848_v4  ;;  %v882_v13 = vpack.c.bf16 %v92_v11, %v88_v10  ;;  %v101_v16 = vld [vmem:[#allocation8 + $0x78] sm:$0xff]  ;;  %881 = vmatprep.subr.bf16.mxu1 %v880_v8  ;;  %v852_v17 = vpack.c.bf16 %v99_v14, %v95_v12  ;;  %v94_v19 = vld [vmem:[#allocation8 + $0x40] sm:$0xff]  ;;  %v96_v21 = vld [vmem:[#allocation8 + $0x50] sm:$0xff] }
  0x3d   :  { %851 = vmatpush1.bf16.msra.mxu0 %v850_v9  ;;  %v884_v18 = vpack.c.bf16 %v101_v16, %v97_v15  ;;  %v98_v20 = vld [vmem:[#allocation8 + $0x60] sm:$0xff]  ;;  %v100_v23 = vld [vmem:[#allocation8 + $0x70] sm:$0xff]  ;;  %v103_v24 = vld [vmem:[#allocation8 + $0x88] sm:$0xff] }
  0x3e   :  { %883 = vmatpush1.bf16.msra.mxu1 %v882_v13  ;;  %v854_v22 = vpack.c.bf16 %v98_v20, %v94_v19  ;;  %v107_v25 = vld [vmem:[#allocation8 + $0xa8] sm:$0xff]  ;;  %853 = vmatprep.subr.bf16.mxu0 %v852_v17  ;;  %v886_v26 = vpack.c.bf16 %v100_v23, %v96_v21  ;;  %v105_v28 = vld [vmem:[#allocation8 + $0x98] sm:$0xff]  ;;  %v102_v30 = vld [vmem:[#allocation8 + $0x80] sm:$0xff] }
  0x3f   :  { %885 = vmatprep.subr.bf16.mxu1 %v884_v18  ;;  %v856_v27 = vpack.c.bf16 %v107_v25, %v103_v24  ;;  %v109_v29 = vld [vmem:[#allocation8 + $0xb8] sm:$0xff]  ;;  %v106_v32 = vld [vmem:[#allocation8 + $0xa0] sm:$0xff]  ;;  %v104_v33 = vld [vmem:[#allocation8 + $0x90] sm:$0xff] }
  0x40   :  { %v888_v31 = vpack.c.bf16 %v109_v29, %v105_v28  ;;  %v108_v34 = vld [vmem:[#allocation8 + $0xb0] sm:$0xff]  ;;  %v858_v35 = vpack.c.bf16 %v106_v32, %v102_v30  ;;  %v111_v36 = vld [vmem:[#allocation8 + $0xc8] sm:$0xff]  ;;  %v113_v38 = vld [vmem:[#allocation8 + $0xd8] sm:$0xff] }
  0x41   :  { %855 = vmatpush1.bf16.msra.mxu0 %v854_v22  ;;  %v115_v37 = vld [vmem:[#allocation8 + $0xe8] sm:$0xff]  ;;  %v890_v39 = vpack.c.bf16 %v108_v34, %v104_v33  ;;  %v117_v41 = vld [vmem:[#allocation8 + $0xf8] sm:$0xff]  ;;  %v110_v42 = vld [vmem:[#allocation8 + $0xc0] sm:$0xff] }
  0x42   :  { %887 = vmatpush1.bf16.msra.mxu1 %v886_v26  ;;  %857 = vmatprep.subr.bf16.mxu0 %v856_v27  ;;  %v860_v40 = vpack.c.bf16 %v115_v37, %v111_v36  ;;  %v114_v43 = vld [vmem:[#allocation8 + $0xe0] sm:$0xff]  ;;  %v892_v44 = vpack.c.bf16 %v117_v41, %v113_v38  ;;  %v112_v45 = vld [vmem:[#allocation8 + $0xd0] sm:$0xff]  ;;  %v119_v47 = vld [vmem:[#allocation8 + $0x108] sm:$0xff] }
  0x43   :  { %889 = vmatprep.subr.bf16.mxu1 %v888_v31  ;;  %v116_v46 = vld [vmem:[#allocation8 + $0xf0] sm:$0xff]  ;;  %v123_v48 = vld [vmem:[#allocation8 + $0x128] sm:$0xff]  ;;  %v121_v49 = vld [vmem:[#allocation8 + $0x118] sm:$0xff]  ;;  %v862_v51 = vpack.c.bf16 %v114_v43, %v110_v42 }
  0x44   :  { %v125_v50 = vld [vmem:[#allocation8 + $0x138] sm:$0xff]  ;;  %v894_v52 = vpack.c.bf16 %v116_v46, %v112_v45  ;;  %v864_v53 = vpack.c.bf16 %v123_v48, %v119_v47  ;;  %v118_v54 = vld [vmem:[#allocation8 + $0x100] sm:$0xff]  ;;  %v120_v56 = vld [vmem:[#allocation8 + $0x110] sm:$0xff] }
  0x45   :  { %859 = vmatpush1.bf16.msra.mxu0 %v858_v35  ;;  %v122_v55 = vld [vmem:[#allocation8 + $0x120] sm:$0xff]  ;;  %v896_v57 = vpack.c.bf16 %v125_v50, %v121_v49  ;;  %v124_v58 = vld [vmem:[#allocation8 + $0x130] sm:$0xff]  ;;  %v127_v59 = vld [vmem:[#allocation8 + $0x148] sm:$0xff]  ;;  %v152_v50 = vlaneseq }
  0x46   :  { %891 = vmatpush1.bf16.msra.mxu1 %v890_v39  ;;  %861 = vmatprep.subr.bf16.mxu0 %v860_v40  ;;  %v131_v60 = vld [vmem:[#allocation8 + $0x168] sm:$0xff]  ;;  %v129_v61 = vld [vmem:[#allocation8 + $0x158] sm:$0xff]  ;;  %v866_v63 = vpack.c.bf16 %v122_v55, %v118_v54  ;;  %v898_v1 = vpack.c.bf16 %v124_v58, %v120_v56  ;;  %v126_v3 = vld [vmem:[#allocation8 + $0x140] sm:$0xff] }
  0x47   :  { %893 = vmatprep.subr.bf16.mxu1 %v892_v44  ;;  %v133_v62 = vld [vmem:[#allocation8 + $0x178] sm:$0xff]  ;;  %v868_v2 = vpack.c.bf16 %v131_v60, %v127_v59  ;;  %v130_v4 = vld [vmem:[#allocation8 + $0x160] sm:$0xff]  ;;  %v128_v5 = vld [vmem:[#allocation8 + $0x150] sm:$0xff] }
  0x48   :  { %v900_v6 = vpack.c.bf16 %v133_v62, %v129_v61  ;;  %v132_v7 = vld [vmem:[#allocation8 + $0x170] sm:$0xff]  ;;  %v135_v8 = vld [vmem:[#allocation8 + $0x188] sm:$0xff]  ;;  %v137_v10 = vld [vmem:[#allocation8 + $0x198] sm:$0xff]  ;;  %v870_v12 = vpack.c.bf16 %v130_v4, %v126_v3 }
  0x49   :  { %863 = vmatpush1.bf16.msra.mxu0 %v862_v51  ;;  %v139_v9 = vld [vmem:[#allocation8 + $0x1a8] sm:$0xff]  ;;  %v141_v11 = vld [vmem:[#allocation8 + $0x1b8] sm:$0xff]  ;;  %v902_v13 = vpack.c.bf16 %v132_v7, %v128_v5  ;;  %v134_v15 = vld [vmem:[#allocation8 + $0x180] sm:$0xff]  ;;  %v153_v51 = vshrl.u32 %v152_v50, 7 }
  0x4a   :  { %895 = vmatpush1.bf16.msra.mxu1 %v894_v52  ;;  %865 = vmatprep.subr.bf16.mxu0 %v864_v53  ;;  %v872_v14 = vpack.c.bf16 %v139_v9, %v135_v8  ;;  %v138_v16 = vld [vmem:[#allocation8 + $0x1a0] sm:$0xff]  ;;  %v136_v17 = vld [vmem:[#allocation8 + $0x190] sm:$0xff]  ;;  %v904_v18 = vpack.c.bf16 %v141_v11, %v137_v10  ;;  %v143_v20 = vld [vmem:[#allocation8 + $0x1c8] sm:$0xff] }
  0x4b   :  { %897 = vmatprep.subr.bf16.mxu1 %v896_v57  ;;  %v140_v19 = vld [vmem:[#allocation8 + $0x1b0] sm:$0xff]  ;;  %v147_v21 = vld [vmem:[#allocation8 + $0x1e8] sm:$0xff]  ;;  %v145_v22 = vld [vmem:[#allocation8 + $0x1d8] sm:$0xff]  ;;  %v874_v24 = vpack.c.bf16 %v138_v16, %v134_v15  ;;  %v154_v52 = vsub.s32 0, %v153_v51  ;;  %v162_v54 = vsub.s32 2, %v153_v51  ;;  %v158_v55 = vsub.s32 1, %v153_v51 }
  0x4c   :  { %v149_v23 = vld [vmem:[#allocation8 + $0x1f8] sm:$0xff]  ;;  %v906_v25 = vpack.c.bf16 %v140_v19, %v136_v17  ;;  %v876_v26 = vpack.c.bf16 %v147_v21, %v143_v20  ;;  %v142_v27 = vld [vmem:[#allocation8 + $0x1c0] sm:$0xff]  ;;  %v144_v30 = vld [vmem:[#allocation8 + $0x1d0] sm:$0xff]  ;;  %v166_v56 = vsub.s32 3, %v153_v51 }
  0x4d   :  { %867 = vmatpush1.bf16.msra.mxu0 %v866_v63  ;;  %v146_v28 = vld [vmem:[#allocation8 + $0x1e0] sm:$0xff]  ;;  %v908_v29 = vpack.c.bf16 %v149_v23, %v145_v22  ;;  %v148_v31 = vld [vmem:[#allocation8 + $0x1f0] sm:$0xff]  ;;  %v71_v35 = vld [vmem:[#allocation3 + $0x8] sm:$0xff] }
  0x4e   :  { %899 = vmatpush1.bf16.msra.mxu1 %v898_v1  ;;  %869 = vmatprep.subr.bf16.mxu0 %v868_v2  ;;  %v878_v32 = vpack.c.bf16 %v146_v28, %v142_v27  ;;  %v910_v33 = vpack.c.bf16 %v148_v31, %v144_v30  ;;  %v70_v34 = vld [vmem:[#allocation3] sm:$0xff]  ;;  %v72_v36 = vld [vmem:[#allocation3 + $0x10] sm:$0xff]  ;;  %v73_v37 = vld [vmem:[#allocation3 + $0x18] sm:$0xff] }
  0x4f   :  { %901 = vmatprep.subr.bf16.mxu1 %v900_v6  ;;  %v74_v38 = vld [vmem:[#allocation3 + $0x20] sm:$0xff]  ;;  %v75_v39 = vld [vmem:[#allocation3 + $0x28] sm:$0xff]  ;;  %v76_v40 = vld [vmem:[#allocation3 + $0x30] sm:$0xff] }
  0x50   :  { %v77_v41 = vld [vmem:[#allocation3 + $0x38] sm:$0xff]  ;;  %v78_v42 = vld [vmem:[#allocation3 + $0x40] sm:$0xff]  ;;  %v79_v43 = vld [vmem:[#allocation3 + $0x48] sm:$0xff] }
  0x51   :  { %871 = vmatpush1.bf16.msra.mxu0 %v870_v12  ;;  %v80_v44 = vld [vmem:[#allocation3 + $0x50] sm:$0xff]  ;;  %v81_v45 = vld [vmem:[#allocation3 + $0x58] sm:$0xff]  ;;  %v82_v46 = vld [vmem:[#allocation3 + $0x60] sm:$0xff] }
  0x52   :  { %903 = vmatpush1.bf16.msra.mxu1 %v902_v13  ;;  %873 = vmatprep.subr.bf16.mxu0 %v872_v14  ;;  %v83_v47 = vld [vmem:[#allocation3 + $0x68] sm:$0xff]  ;;  %v84_v48 = vld [vmem:[#allocation3 + $0x70] sm:$0xff]  ;;  %v85_v49 = vld [vmem:[#allocation3 + $0x78] sm:$0xff] }
  0x53   :  { %905 = vmatprep.subr.bf16.mxu1 %v904_v18  ;;  %v150_v53 = vld [vmem:[%s1511_s3] sm:$0xf]  ;;  %s1208_s3 = smov [#allocation10]  }
  0x54   :  { %v1324_v57 = vrot.slane %v150_v53, %v154_v52  ;;  %v1326_v58 = vrot.slane %v150_v53, %v162_v54  ;;  %v1328_v59 = vrot.slane %v150_v53, %v158_v55  ;;  %v1330_v60 = vrot.slane %v150_v53, %v166_v56  ;;  %s831_s9 = sshll.u32 %s1208_s3, 4  ;;  %s832_s9 = int_to_ptr.vmem [resolvable:$true] %s831_s9 }
  0x55   :  { %875 = vmatpush1.bf16.msra.mxu0 %v874_v24  ;;  %s1148_s10 = scalar_lea.vmem %s832_s9, 256  ;;  %p1153_p11 = scmp.lt.s32.totalorder %s832_s9, %s832_s9 }
  0x56   :  { %907 = vmatpush1.bf16.msra.mxu1 %v906_v25  ;;  %877 = vmatprep.subr.bf16.mxu0 %v876_v26  ;;  %p1149_p10 = scmp.ne.s32.totalorder %s832_s9, %s1148_s10  ;;  %p1154_p12 = scmp.lt.s32.totalorder %s1148_s10, %s1148_s10 }
  0x57   :  { %909 = vmatprep.subr.bf16.mxu1 %v908_v29 }
  0x58   :  { %p1155_p13 = por %p1154_p12, %p1153_p11 }
  0x59   :  { %879 = vmatpush1.bf16.msra.mxu0 %v878_v32 }
  0x5a   :  { %911 = vmatpush1.bf16.msra.mxu1 %v910_v33  ;;  %p1156_p0 = pnand %p1155_p13, %p1149_p10 }
  0x5c   :  { %237 = vmatmul.mubr.f32.vlgmr.msra.gmra.mrb[0].mxu0 %v70_v34 }
  0x5d   :  { %398 = vmatmul.mubr.f32.vlgmr.msra.gmra.mrb[0].mxu1 %v70_v34  ;;  %242 = vmatprep.mubr.f32.mxu0 %v1207_v0 }
  0x5e   :  { %403 = vmatprep.mubr.f32.mxu1 %v1207_v0 }
  0x60   :  { %243 = vmatmul.mubr.f32.gmra.mrb[2].mxu0 %v71_v35 }
  0x61   :  { %404 = vmatmul.mubr.f32.gmra.mrb[2].mxu1 %v71_v35  ;;  %248 = vmatprep.mubr.f32.mxu0 %v1207_v0 }
  0x62   :  { %409 = vmatprep.mubr.f32.mxu1 %v1207_v0 }
  0x64   :  { %249 = vmatmul.mubr.f32.gmra.mrb[4].mxu0 %v72_v36 }
  0x65   :  { %410 = vmatmul.mubr.f32.gmra.mrb[4].mxu1 %v72_v36  ;;  %254 = vmatprep.mubr.f32.mxu0 %v1207_v0 }
  0x66   :  { %415 = vmatprep.mubr.f32.mxu1 %v1207_v0 }
  0x68   :  { %255 = vmatmul.mubr.f32.gmra.mrb[6].mxu0 %v73_v37 }
  0x69   :  { %416 = vmatmul.mubr.f32.gmra.mrb[6].mxu1 %v73_v37  ;;  %260 = vmatprep.mubr.f32.mxu0 %v1207_v0 }
  0x6a   :  { %421 = vmatprep.mubr.f32.mxu1 %v1207_v0 }
  0x6c   :  { %261 = vmatmul.mubr.f32.gmra.mrb[8].mxu0 %v74_v38 }
  0x6d   :  { %422 = vmatmul.mubr.f32.gmra.mrb[8].mxu1 %v74_v38  ;;  %266 = vmatprep.mubr.f32.mxu0 %v1207_v0 }
  0x6e   :  { %427 = vmatprep.mubr.f32.mxu1 %v1207_v0 }
  0x70   :  { %267 = vmatmul.mubr.f32.gmra.mrb[10].mxu0 %v75_v39 }
  0x71   :  { %428 = vmatmul.mubr.f32.gmra.mrb[10].mxu1 %v75_v39  ;;  %272 = vmatprep.mubr.f32.mxu0 %v1207_v0 }
  0x72   :  { %433 = vmatprep.mubr.f32.mxu1 %v1207_v0 }
  0x74   :  { %273 = vmatmul.mubr.f32.gmra.mrb[12].mxu0 %v76_v40 }
  0x75   :  { %434 = vmatmul.mubr.f32.gmra.mrb[12].mxu1 %v76_v40  ;;  %278 = vmatprep.mubr.f32.mxu0 %v1207_v0 }
  0x76   :  { %439 = vmatprep.mubr.f32.mxu1 %v1207_v0 }
  0x78   :  { %279 = vmatmul.mubr.f32.gmra.mrb[14].mxu0 %v77_v41 }
  0x79   :  { %440 = vmatmul.mubr.f32.gmra.mrb[14].mxu1 %v77_v41  ;;  %284 = vmatprep.mubr.f32.mxu0 %v1207_v0 }
  0x7a   :  { %445 = vmatprep.mubr.f32.mxu1 %v1207_v0 }
  0x7c   :  { %285 = vmatmul.mubr.f32.gmra.mrb[16].mxu0 %v78_v42 }
  0x7d   :  { %446 = vmatmul.mubr.f32.gmra.mrb[16].mxu1 %v78_v42  ;;  %290 = vmatprep.mubr.f32.mxu0 %v1207_v0 }
  0x7e   :  { %451 = vmatprep.mubr.f32.mxu1 %v1207_v0 }
  0x80   :  { %291 = vmatmul.mubr.f32.gmra.mrb[18].mxu0 %v79_v43 }
  0x81   :  { %452 = vmatmul.mubr.f32.gmra.mrb[18].mxu1 %v79_v43  ;;  %296 = vmatprep.mubr.f32.mxu0 %v1207_v0 }
  0x82   :  { %457 = vmatprep.mubr.f32.mxu1 %v1207_v0 }
  0x84   :  { %297 = vmatmul.mubr.f32.gmra.mrb[20].mxu0 %v80_v44 }
  0x85   :  { %458 = vmatmul.mubr.f32.gmra.mrb[20].mxu1 %v80_v44  ;;  %302 = vmatprep.mubr.f32.mxu0 %v1207_v0 }
  0x86   :  { %463 = vmatprep.mubr.f32.mxu1 %v1207_v0 }
  0x88   :  { %303 = vmatmul.mubr.f32.gmra.mrb[22].mxu0 %v81_v45 }
  0x89   :  { %464 = vmatmul.mubr.f32.gmra.mrb[22].mxu1 %v81_v45  ;;  %308 = vmatprep.mubr.f32.mxu0 %v1207_v0 }
  0x8a   :  { %469 = vmatprep.mubr.f32.mxu1 %v1207_v0 }
  0x8c   :  { %309 = vmatmul.mubr.f32.gmra.mrb[24].mxu0 %v82_v46 }
  0x8d   :  { %470 = vmatmul.mubr.f32.gmra.mrb[24].mxu1 %v82_v46  ;;  %314 = vmatprep.mubr.f32.mxu0 %v1207_v0  ;;  %v66_v46 = vld [vmem:[#allocation6] sm:$0xff] }
  0x8e   :  { %475 = vmatprep.mubr.f32.mxu1 %v1207_v0 }
  0x90   :  { %315 = vmatmul.mubr.f32.gmra.mrb[26].mxu0 %v83_v47 }
  0x91   :  { %476 = vmatmul.mubr.f32.gmra.mrb[26].mxu1 %v83_v47  ;;  %320 = vmatprep.mubr.f32.mxu0 %v1207_v0 }
  0x92   :  { %481 = vmatprep.mubr.f32.mxu1 %v1207_v0 }
  0x94   :  { %321 = vmatmul.mubr.f32.gmra.mrb[28].mxu0 %v84_v48 }
  0x95   :  { %482 = vmatmul.mubr.f32.gmra.mrb[28].mxu1 %v84_v48  ;;  %326 = vmatprep.mubr.f32.mxu0 %v1207_v0 }
  0x96   :  { %487 = vmatprep.mubr.f32.mxu1 %v1207_v0 }
  0x98   :  { %327 = vmatmul.mubr.f32.gmra.mrb[30].mxu0 %v85_v49 }
  0x99   :  { %488 = vmatmul.mubr.f32.gmra.mrb[30].mxu1 %v85_v49 }
 0x12f   :  { %v238_v0 = vpop.f32.mrb[0].mxu0 }
 0x130   :  { %v239_v61 = vadd.f32 %v238_v0, %v1324_v57  ;;  %v399_v62 = vpop.f32.mrb[0].mxu1  ;;  %v240_v63 = vpop.f32.mrb[1].mxu0 }
 0x131   :  { %v400_v1 = vadd.f32 %v399_v62, %v1326_v58  ;;  %v241_v2 = vadd.f32 %v240_v63, %v1328_v59  ;;  %v401_v3 = vpop.f32.mrb[1].mxu1 }
 0x132   :  { %v494_v4 = vmul.f32 0.5, %v239_v61  ;;  %v402_v5 = vadd.f32 %v401_v3, %v1330_v60 }
 0x133   :  { %v574_v6 = vmul.f32 0.5, %v400_v1  ;;  %922 = vtanh.f32 %v241_v2  ;;  %v244_v7 = vpop.f32.mrb[2].mxu0 }
 0x134   :  { %924 = vtanh.f32 %v494_v4  ;;  %v654_v8 = vmul.f32 0.5, %v402_v5  ;;  %v245_v9 = vadd.f32 %v244_v7, %v1324_v57  ;;  %v405_v10 = vpop.f32.mrb[2].mxu1  ;;  %v246_v11 = vpop.f32.mrb[3].mxu0  ;;  %v67_v7 = vld [vmem:[#allocation6 + $0x8] sm:$0xff] }
 0x135   :  { %926 = vtanh.f32 %v574_v6  ;;  %v406_v12 = vadd.f32 %v405_v10, %v1326_v58  ;;  %v247_v13 = vadd.f32 %v246_v11, %v1328_v59  ;;  %v407_v14 = vpop.f32.mrb[3].mxu1 }
 0x136   :  { %928 = vtanh.f32 %v654_v8  ;;  %v495_v15 = vmul.f32 0.5, %v245_v9  ;;  %v408_v16 = vadd.f32 %v407_v14, %v1330_v60 }
 0x137   :  { %v575_v17 = vmul.f32 0.5, %v406_v12  ;;  %930 = vtanh.f32 %v247_v13  ;;  %v250_v18 = vpop.f32.mrb[4].mxu0 }
 0x138   :  { %932 = vtanh.f32 %v495_v15  ;;  %v655_v19 = vmul.f32 0.5, %v408_v16  ;;  %v251_v20 = vadd.f32 %v250_v18, %v1324_v57  ;;  %v411_v21 = vpop.f32.mrb[4].mxu1  ;;  %v252_v22 = vpop.f32.mrb[5].mxu0 }
 0x139   :  { %934 = vtanh.f32 %v575_v17  ;;  %v412_v23 = vadd.f32 %v411_v21, %v1326_v58  ;;  %v253_v24 = vadd.f32 %v252_v22, %v1328_v59  ;;  %v413_v25 = vpop.f32.mrb[5].mxu1 }
 0x13a   :  { %936 = vtanh.f32 %v655_v19  ;;  %v496_v26 = vmul.f32 0.5, %v251_v20  ;;  %v414_v27 = vadd.f32 %v413_v25, %v1330_v60 }
 0x13b   :  { %v576_v28 = vmul.f32 0.5, %v412_v23  ;;  %938 = vtanh.f32 %v253_v24  ;;  %v256_v29 = vpop.f32.mrb[6].mxu0 }
 0x13c   :  { %940 = vtanh.f32 %v496_v26  ;;  %v656_v30 = vmul.f32 0.5, %v414_v27  ;;  %v257_v31 = vadd.f32 %v256_v29, %v1324_v57  ;;  %v417_v32 = vpop.f32.mrb[6].mxu1  ;;  %v258_v33 = vpop.f32.mrb[7].mxu0 }
 0x13d   :  { %v923_v34 = vpop.eup %922  ;;  %942 = vtanh.f32 %v576_v28  ;;  %v418_v35 = vadd.f32 %v417_v32, %v1326_v58  ;;  %v259_v36 = vadd.f32 %v258_v33, %v1328_v59  ;;  %v419_v37 = vpop.f32.mrb[7].mxu1 }
 0x13e   :  { %v925_v38 = vpop.eup %924  ;;  %944 = vtanh.f32 %v656_v30  ;;  %v497_v39 = vmul.f32 0.5, %v257_v31  ;;  %v420_v40 = vadd.f32 %v419_v37, %v1330_v60 }
 0x13f   :  { %v927_v41 = vpop.eup %926  ;;  %v526_v42 = vadd.f32 1.0, %v925_v38  ;;  %v577_v43 = vmul.f32 0.5, %v418_v35  ;;  %946 = vtanh.f32 %v259_v36  ;;  %v262_v44 = vpop.f32.mrb[8].mxu0 }
 0x140   :  { %v929_v45 = vpop.eup %928  ;;  %v606_v47 = vadd.f32 1.0, %v927_v41  ;;  %948 = vtanh.f32 %v497_v39  ;;  %v657_v48 = vmul.f32 0.5, %v420_v40  ;;  %v263_v49 = vadd.f32 %v262_v44, %v1324_v57  ;;  %v423_v50 = vpop.f32.mrb[8].mxu1 }
 0x141   :  { %v264_v51 = vpop.f32.mrb[9].mxu0  ;;  %v931_v52 = vpop.eup %930  ;;  %v542_v53 = vmul.f32 0.5, %v526_v42  ;;  %950 = vtanh.f32 %v577_v43  ;;  %v424_v54 = vadd.f32 %v423_v50, %v1326_v58  ;;  %v686_v13 = vadd.f32 1.0, %v929_v45 }
 0x142   :  { %v425_v55 = vpop.f32.mrb[9].mxu1  ;;  %v933_v56 = vpop.eup %932  ;;  %v622_v0 = vmul.f32 0.5, %v606_v47  ;;  %952 = vtanh.f32 %v657_v48  ;;  %v498_v61 = vmul.f32 0.5, %v263_v49  ;;  %v265_v3 = vadd.f32 %v264_v51, %v1328_v59 }
 0x143   :  { %v935_v62 = vpop.eup %934  ;;  %v720_v63 = vmul.f32 %v542_v53, %v66_v46  ;;  %v527_v1 = vadd.f32 1.0, %v933_v56  ;;  %v578_v2 = vmul.f32 0.5, %v424_v54  ;;  %v268_v4 = vpop.f32.mrb[10].mxu0  ;;  %v426_v9 = vadd.f32 %v425_v55, %v1330_v60 }
 0x144   :  { %v937_v5 = vpop.eup %936  ;;  %v638_v6 = vmul.f32 %v923_v34, %v622_v0  ;;  %v607_v8 = vadd.f32 1.0, %v935_v62  ;;  %954 = vtanh.f32 %v498_v61  ;;  %v429_v10 = vpop.f32.mrb[10].mxu1  ;;  %v269_v15 = vadd.f32 %v268_v4, %v1324_v57 }
 0x145   :  { %v270_v11 = vpop.f32.mrb[11].mxu0  ;;  %v939_v12 = vpop.eup %938  ;;  %v543_v14 = vmul.f32 0.5, %v527_v1  ;;  %956 = vtanh.f32 %v578_v2  ;;  %v687_v20 = vadd.f32 1.0, %v937_v5  ;;  %v658_v21 = vmul.f32 0.5, %v426_v9 }
 0x146   :  { %v431_v16 = vpop.f32.mrb[11].mxu1  ;;  %v941_v17 = vpop.eup %940  ;;  %v722_v18 = vadd.f32 %v720_v63, %v638_v6  ;;  %v623_v19 = vmul.f32 0.5, %v607_v8  ;;  %958 = vtanh.f32 %v265_v3  ;;  %v499_v25 = vmul.f32 0.5, %v269_v15 }
 0x147   :  { %v943_v22 = vpop.eup %942  ;;  %v721_v23 = vmul.f32 %v543_v14, %v67_v7  ;;  %v528_v24 = vadd.f32 1.0, %v941_v17  ;;  %v274_v26 = vpop.f32.mrb[12].mxu0  ;;  %v430_v30 = vadd.f32 %v429_v10, %v1326_v58  ;;  %v702_v34 = vmul.f32 0.5, %v686_v13 }
 0x148   :  { %v945_v27 = vpop.eup %944  ;;  %960 = vtanh.f32 %v722_v18  ;;  %v639_v28 = vmul.f32 %v931_v52, %v623_v19  ;;  %v608_v29 = vadd.f32 1.0, %v943_v22  ;;  %v435_v31 = vpop.f32.mrb[12].mxu1  ;;  %v271_v36 = vadd.f32 %v270_v11, %v1328_v59 }
 0x149   :  { %v276_v32 = vpop.f32.mrb[13].mxu0  ;;  %v947_v33 = vpop.eup %946  ;;  %v544_v35 = vmul.f32 0.5, %v528_v24  ;;  %962 = vtanh.f32 %v658_v21  ;;  %v579_v41 = vmul.f32 0.5, %v430_v30  ;;  %v1355_v43 = vmul.f32 0.5, %v687_v20 }
 0x14a   :  { %v437_v37 = vpop.f32.mrb[13].mxu1  ;;  %v949_v38 = vpop.eup %948  ;;  %v723_v39 = vadd.f32 %v721_v23, %v639_v28  ;;  %v624_v40 = vmul.f32 0.5, %v608_v29  ;;  %964 = vtanh.f32 %v499_v25  ;;  %v432_v50 = vadd.f32 %v431_v16, %v1330_v60 }
 0x14b   :  { %v951_v42 = vpop.eup %950  ;;  %v730_v44 = vmul.f32 %v722_v18, %v544_v35  ;;  %v529_v45 = vadd.f32 1.0, %v949_v38  ;;  %966 = vtanh.f32 %v271_v36  ;;  %v280_v46 = vpop.f32.mrb[14].mxu0  ;;  %v688_v53 = vadd.f32 1.0, %v945_v27 }
 0x14c   :  { %v953_v47 = vpop.eup %952  ;;  %968 = vtanh.f32 %v723_v39  ;;  %v640_v48 = vmul.f32 %v939_v12, %v624_v40  ;;  %v609_v49 = vadd.f32 1.0, %v951_v42  ;;  %v441_v51 = vpop.f32.mrb[14].mxu1  ;;  %v275_v55 = vadd.f32 %v274_v26, %v1324_v57 }
 0x14d   :  { %v282_v52 = vpop.f32.mrb[15].mxu0  ;;  %v545_v54 = vmul.f32 0.5, %v529_v45  ;;  %970 = vtanh.f32 %v579_v41  ;;  %v443_v56 = vpop.f32.mrb[15].mxu1  ;;  %v659_v63 = vmul.f32 0.5, %v432_v50  ;;  %v436_v1 = vadd.f32 %v435_v31, %v1326_v58 }
 0x14e   :  { %v955_v0 = vpop.eup %954  ;;  %v732_v61 = vadd.f32 %v730_v44, %v640_v48  ;;  %v625_v62 = vmul.f32 0.5, %v609_v49  ;;  %v689_v4 = vadd.f32 1.0, %v953_v47  ;;  %v500_v6 = vmul.f32 0.5, %v275_v55 }
 0x14f   :  { %v957_v2 = vpop.eup %956  ;;  %v731_v3 = vmul.f32 %v723_v39, %v545_v54  ;;  %v530_v5 = vadd.f32 1.0, %v955_v0  ;;  %v286_v7 = vpop.f32.mrb[16].mxu0  ;;  %v580_v10 = vmul.f32 0.5, %v436_v1  ;;  %v277_v15 = vadd.f32 %v276_v32, %v1328_v59 }
 0x150   :  { %972 = vtanh.f32 %v732_v61  ;;  %v641_v8 = vmul.f32 %v947_v33, %v625_v62  ;;  %v610_v9 = vadd.f32 1.0, %v957_v2  ;;  %v447_v11 = vpop.f32.mrb[16].mxu1  ;;  %v288_v12 = vpop.f32.mrb[17].mxu0  ;;  %v438_v16 = vadd.f32 %v437_v37, %v1330_v60 }
 0x151   :  { %v959_v13 = vpop.eup %958  ;;  %v546_v14 = vmul.f32 0.5, %v530_v5  ;;  %974 = vtanh.f32 %v659_v63  ;;  %v449_v17 = vpop.f32.mrb[17].mxu1  ;;  %v281_v21 = vadd.f32 %v280_v46, %v1324_v57  ;;  %v704_v28 = vmul.f32 0.5, %v688_v53 }
 0x152   :  { %v961_v18 = vpop.eup %960  ;;  %v733_v19 = vadd.f32 %v731_v3, %v641_v8  ;;  %v626_v20 = vmul.f32 0.5, %v610_v9  ;;  %976 = vtanh.f32 %v500_v6  ;;  %v660_v25 = vmul.f32 0.5, %v438_v16 }
 0x153   :  { %v963_v22 = vpop.eup %962  ;;  %v726_v23 = vmul.f32 %v961_v18, %v702_v34  ;;  %v741_v24 = vmul.f32 %v732_v61, %v546_v14  ;;  %978 = vtanh.f32 %v580_v10  ;;  %v292_v26 = vpop.f32.mrb[18].mxu0  ;;  %v501_v30 = vmul.f32 0.5, %v281_v21 }
 0x154   :  { %v965_v27 = vpop.eup %964  ;;  %980 = vtanh.f32 %v733_v19  ;;  %v642_v29 = vmul.f32 %v959_v13, %v626_v20  ;;  %v453_v31 = vpop.f32.mrb[18].mxu1  ;;  %v705_v35 = vmul.f32 0.5, %v689_v4  ;;  %v442_v37 = vadd.f32 %v441_v51, %v1326_v58 }
 0x155   :  { %v1363_v32 = vpop.f32.mrb[19].mxu0  ;;  %v967_v33 = vpop.eup %966  ;;  %728 = vst [vmem:[#allocation9] sm:$0xff] %v726_v23  ;;  %v531_v36 = vadd.f32 1.0, %v965_v27  ;;  %982 = vtanh.f32 %v277_v15  ;;  %v283_v40 = vadd.f32 %v282_v52, %v1328_v59  ;;  %v444_v41 = vadd.f32 %v443_v56, %v1330_v60 }
 0x156   :  { %v1366_v34 = vpop.f32.mrb[19].mxu1  ;;  %v969_v38 = vpop.eup %968  ;;  %v1368_v39 = vadd.f32 %v741_v24, %v642_v29  ;;  %984 = vtanh.f32 %v660_v25  ;;  %v581_v46 = vmul.f32 0.5, %v442_v37  ;;  %v287_v50 = vadd.f32 %v286_v7, %v1324_v57 }
 0x157   :  { %v971_v42 = vpop.eup %970  ;;  %v727_v44 = vmul.f32 %v969_v38, %v1355_v43  ;;  %v547_v45 = vmul.f32 0.5, %v531_v36  ;;  %986 = vtanh.f32 %v501_v30  ;;  %v298_v47 = vpop.f32.mrb[20].mxu0  ;;  %v661_v49 = vmul.f32 0.5, %v444_v41 }
 0x158   :  { %988 = vtanh.f32 %v1368_v39  ;;  %v611_v48 = vadd.f32 1.0, %v971_v42  ;;  %v1375_v51 = vpop.f32.mrb[20].mxu1  ;;  %v1377_v53 = vpop.f32.mrb[21].mxu0  ;;  %v448_v54 = vadd.f32 %v447_v11, %v1326_v58  ;;  %v289_v43 = vadd.f32 %v288_v12, %v1328_v59 }
 0x159   :  { %729 = vst [vmem:[#allocation9 + $0x8] sm:$0xff] %v727_v44  ;;  %v742_v52 = vmul.f32 %v733_v19, %v547_v45  ;;  %990 = vtanh.f32 %v581_v46  ;;  %v1381_v55 = vpop.f32.mrb[21].mxu1  ;;  %v502_v61 = vmul.f32 0.5, %v287_v50  ;;  %v450_v62 = vadd.f32 %v449_v17, %v1330_v60 }
 0x15a   :  { %v973_v56 = vpop.eup %972  ;;  %v627_v0 = vmul.f32 0.5, %v611_v48  ;;  %992 = vtanh.f32 %v283_v40  ;;  %v582_v2 = vmul.f32 0.5, %v448_v54  ;;  %v293_v3 = vadd.f32 %v292_v26, %v1324_v57 }
 0x15b   :  { %v975_v63 = vpop.eup %974  ;;  %v736_v1 = vmul.f32 %v973_v56, %v704_v28  ;;  %994 = vtanh.f32 %v661_v49  ;;  %v1385_v4 = vpop.f32.mrb[22].mxu0  ;;  %v690_v6 = vadd.f32 1.0, %v963_v22  ;;  %v662_v8 = vmul.f32 0.5, %v450_v62 }
 0x15c   :  { %v977_v5 = vpop.eup %976  ;;  %v643_v7 = vmul.f32 %v967_v33, %v627_v0  ;;  %996 = vtanh.f32 %v502_v61  ;;  %v1387_v9 = vpop.f32.mrb[22].mxu1  ;;  %v503_v13 = vmul.f32 0.5, %v293_v3  ;;  %v454_v14 = vadd.f32 %v453_v31, %v1326_v58 }
 0x15d   :  { %v1389_v10 = vpop.f32.mrb[23].mxu0  ;;  %v979_v11 = vpop.eup %978  ;;  %739 = vst [vmem:[#allocation9 + $0x10] sm:$0xff] %v736_v1  ;;  %v532_v12 = vadd.f32 1.0, %v977_v5  ;;  %998 = vtanh.f32 %v582_v2  ;;  %v295_v26 = vadd.f32 %v1363_v32, %v1328_v59  ;;  %v456_v27 = vadd.f32 %v1366_v34, %v1330_v60 }
 0x15e   :  { %v1392_v15 = vpop.f32.mrb[23].mxu1  ;;  %v981_v16 = vpop.eup %980  ;;  %v744_v17 = vadd.f32 %v742_v52, %v643_v7  ;;  %v612_v18 = vadd.f32 1.0, %v979_v11  ;;  %1000 = vtanh.f32 %v289_v43  ;;  %v583_v22 = vmul.f32 0.5, %v454_v14 }
 0x15f   :  { %v983_v19 = vpop.eup %982  ;;  %v737_v20 = vmul.f32 %v981_v16, %v705_v35  ;;  %v548_v21 = vmul.f32 0.5, %v532_v12  ;;  %1002 = vtanh.f32 %v662_v8  ;;  %v1394_v23 = vpop.f32.mrb[24].mxu0  ;;  %v706_v31 = vmul.f32 0.5, %v690_v6 }
 0x160   :  { %v985_v24 = vpop.eup %984  ;;  %1004 = vtanh.f32 %v744_v17  ;;  %v628_v25 = vmul.f32 0.5, %v612_v18  ;;  %v1400_v28 = vpop.f32.mrb[24].mxu1  ;;  %v299_v35 = vadd.f32 %v298_v47, %v1324_v57  ;;  %v691_v41 = vadd.f32 1.0, %v975_v63 }
 0x161   :  { %v1402_v29 = vpop.f32.mrb[25].mxu0  ;;  %v987_v30 = vpop.eup %986  ;;  %740 = vst [vmem:[#allocation9 + $0x18] sm:$0xff] %v737_v20  ;;  %v752_v33 = vmul.f32 %v1368_v39, %v548_v21  ;;  %1006 = vtanh.f32 %v503_v13  ;;  %v663_v42 = vmul.f32 0.5, %v456_v27  ;;  %v692_v54 = vadd.f32 1.0, %v985_v24 }
 0x162   :  { %v1406_v36 = vpop.f32.mrb[25].mxu1  ;;  %v989_v37 = vpop.eup %988  ;;  %v644_v38 = vmul.f32 %v983_v19, %v628_v25  ;;  %v533_v32 = vadd.f32 1.0, %v987_v30  ;;  %1008 = vtanh.f32 %v583_v22  ;;  %v504_v44 = vmul.f32 0.5, %v299_v35 }
 0x163   :  { %v991_v40 = vpop.eup %990  ;;  %v747_v34 = vmul.f32 %v989_v37, %v706_v31  ;;  %v1408_v45 = vpop.f32.mrb[26].mxu0  ;;  %1010 = vtanh.f32 %v295_v26  ;;  %v460_v43 = vadd.f32 %v1375_v51, %v1326_v58  ;;  %v301_v56 = vadd.f32 %v1377_v53, %v1328_v59 }
 0x164   :  { %v993_v46 = vpop.eup %992  ;;  %v754_v48 = vadd.f32 %v752_v33, %v644_v38  ;;  %v549_v49 = vmul.f32 0.5, %v533_v32  ;;  %v613_v39 = vadd.f32 1.0, %v991_v40  ;;  %v1410_v50 = vpop.f32.mrb[26].mxu1  ;;  %1012 = vtanh.f32 %v504_v44 }
 0x165   :  { %v1412_v47 = vpop.f32.mrb[27].mxu0  ;;  %v995_v52 = vpop.eup %994  ;;  %750 = vst [vmem:[#allocation9 + $0x20] sm:$0xff] %v747_v34  ;;  %v462_v1 = vadd.f32 %v1381_v55, %v1330_v60  ;;  %v707_v3 = vmul.f32 0.5, %v691_v41  ;;  %v584_v6 = vmul.f32 0.5, %v460_v43  ;;  %v305_v53 = vadd.f32 %v1385_v4, %v1324_v57 }
 0x166   :  { %v1418_v0 = vpop.f32.mrb[27].mxu1  ;;  %v997_v61 = vpop.eup %996  ;;  %1014 = vtanh.f32 %v754_v48  ;;  %v753_v62 = vmul.f32 %v744_v17, %v549_v49  ;;  %v629_v63 = vmul.f32 0.5, %v613_v39  ;;  %v708_v16 = vmul.f32 0.5, %v692_v54 }
 0x167   :  { %v999_v2 = vpop.eup %998  ;;  %v534_v5 = vadd.f32 1.0, %v997_v61  ;;  %v1422_v7 = vpop.f32.mrb[28].mxu0  ;;  %1016 = vtanh.f32 %v663_v42  ;;  %v466_v17 = vadd.f32 %v1387_v9, %v1326_v58  ;;  %v664_v22 = vmul.f32 0.5, %v462_v1 }
 0x168   :  { %v1001_v8 = vpop.eup %1000  ;;  %v645_v51 = vmul.f32 %v993_v46, %v629_v63  ;;  %v614_v11 = vadd.f32 1.0, %v999_v2  ;;  %v1426_v12 = vpop.f32.mrb[28].mxu1  ;;  %1018 = vtanh.f32 %v584_v6  ;;  %v505_v26 = vmul.f32 0.5, %v305_v53 }
 0x169   :  { %v1428_v13 = vpop.f32.mrb[29].mxu0  ;;  %v1003_v14 = vpop.eup %1002  ;;  %v550_v55 = vmul.f32 0.5, %v534_v5  ;;  %1020 = vtanh.f32 %v301_v56  ;;  %v585_v27 = vmul.f32 0.5, %v466_v17  ;;  %v307_v9 = vadd.f32 %v1389_v10, %v1328_v59 }
 0x16a   :  { %v1432_v18 = vpop.f32.mrb[29].mxu1  ;;  %v1005_v19 = vpop.eup %1004  ;;  %v755_v20 = vadd.f32 %v753_v62, %v645_v51  ;;  %v630_v21 = vmul.f32 0.5, %v614_v11  ;;  %v468_v40 = vadd.f32 %v1392_v15, %v1330_v60  ;;  %v311_v34 = vadd.f32 %v1394_v23, %v1324_v57 }
 0x16b   :  { %v1007_v24 = vpop.eup %1006  ;;  %v748_v4 = vmul.f32 %v1005_v19, %v707_v3  ;;  %v763_v25 = vmul.f32 %v754_v48, %v550_v55  ;;  %v1434_v30 = vpop.f32.mrb[30].mxu0  ;;  %v472_v10 = vadd.f32 %v1400_v28, %v1326_v58  ;;  %v693_v49 = vadd.f32 1.0, %v995_v52 }
 0x16c   :  { %v1009_v31 = vpop.eup %1008  ;;  %1022 = vtanh.f32 %v755_v20  ;;  %v646_v33 = vmul.f32 %v1001_v8, %v630_v21  ;;  %v535_v35 = vadd.f32 1.0, %v1007_v24  ;;  %v1438_v37 = vpop.f32.mrb[30].mxu1  ;;  %v694_v39 = vadd.f32 1.0, %v1003_v14 }
 0x16d   :  { %v1440_v38 = vpop.f32.mrb[31].mxu0  ;;  %751 = vst [vmem:[#allocation9 + $0x28] sm:$0xff] %v748_v4  ;;  %v615_v32 = vadd.f32 1.0, %v1009_v31  ;;  %1024 = vtanh.f32 %v505_v26  ;;  %v1446_v41 = vpop.f32.mrb[31].mxu1  ;;  %v506_v61 = vmul.f32 0.5, %v311_v34  ;;  %v665_v63 = vmul.f32 0.5, %v468_v40 }
 0x16e   :  { %v1011_v42 = vpop.eup %1010  ;;  %v765_v44 = vadd.f32 %v763_v25, %v646_v33  ;;  %v551_v46 = vmul.f32 0.5, %v535_v35  ;;  %1026 = vtanh.f32 %v585_v27  ;;  %v586_v3 = vmul.f32 0.5, %v472_v10 }
 0x16f   :  { %v1013_v48 = vpop.eup %1012  ;;  %v631_v54 = vmul.f32 0.5, %v615_v32  ;;  %1028 = vtanh.f32 %v664_v22  ;;  %v313_v28 = vadd.f32 %v1402_v29, %v1328_v59  ;;  %v474_v6 = vadd.f32 %v1406_v36, %v1330_v60 }
 0x170   :  { %v1015_v43 = vpop.eup %1014  ;;  %1030 = vtanh.f32 %v765_v44  ;;  %v764_v15 = vmul.f32 %v755_v20, %v551_v46  ;;  %v536_v56 = vadd.f32 1.0, %v1013_v48  ;;  %v317_v8 = vadd.f32 %v1408_v45, %v1324_v57 }
 0x171   :  { %v758_v23 = vmul.f32 %v1015_v43, %v708_v16  ;;  %v647_v62 = vmul.f32 %v1011_v42, %v631_v54  ;;  %1032 = vtanh.f32 %v307_v9  ;;  %v1017_v1 = vpop.eup %1016  ;;  %v478_v51 = vadd.f32 %v1410_v50, %v1326_v58 }
 0x172   :  { %v552_v2 = vmul.f32 0.5, %v536_v56  ;;  %1034 = vtanh.f32 %v506_v61  ;;  %v1019_v52 = vpop.eup %1018  ;;  %v709_v16 = vmul.f32 0.5, %v693_v49  ;;  %v710_v55 = vmul.f32 0.5, %v694_v39 }
 0x173   :  { %761 = vst [vmem:[#allocation9 + $0x30] sm:$0xff] %v758_v23  ;;  %v766_v5 = vadd.f32 %v764_v15, %v647_v62  ;;  %v1021_v11 = vpop.eup %1020  ;;  %v616_v14 = vadd.f32 1.0, %v1019_v52  ;;  %1036 = vtanh.f32 %v586_v3  ;;  %v507_v29 = vmul.f32 0.5, %v317_v8 }
 0x174   :  { %v774_v53 = vmul.f32 %v765_v44, %v552_v2  ;;  %v666_v20 = vmul.f32 0.5, %v474_v6  ;;  %v587_v21 = vmul.f32 0.5, %v478_v51  ;;  %v319_v45 = vadd.f32 %v1412_v47, %v1328_v59 }
 0x175   :  { %1038 = vtanh.f32 %v766_v5  ;;  %v632_v19 = vmul.f32 0.5, %v616_v14  ;;  %v323_v50 = vadd.f32 %v1422_v7, %v1324_v57  ;;  %v695_v4 = vadd.f32 1.0, %v1017_v1 }
 0x176   :  { %v1023_v17 = vpop.eup %1022  ;;  %1040 = vtanh.f32 %v665_v63  ;;  %v484_v35 = vadd.f32 %v1426_v12, %v1326_v58  ;;  %v480_v47 = vadd.f32 %v1418_v0, %v1330_v60  ;;  %v325_v48 = vadd.f32 %v1428_v13, %v1328_v59 }
 0x177   :  { %v1025_v36 = vpop.eup %1024  ;;  %v759_v22 = vmul.f32 %v1023_v17, %v709_v16  ;;  %1042 = vtanh.f32 %v313_v28  ;;  %v648_v25 = vmul.f32 %v1021_v11, %v632_v19  ;;  %v508_v33 = vmul.f32 0.5, %v323_v50 }
 0x178   :  { %v1027_v24 = vpop.eup %1026  ;;  %v537_v26 = vadd.f32 1.0, %v1025_v36  ;;  %1044 = vtanh.f32 %v507_v29  ;;  %v588_v44 = vmul.f32 0.5, %v484_v35  ;;  %v329_v39 = vadd.f32 %v1434_v30, %v1324_v57 }
 0x179   :  { %v1029_v27 = vpop.eup %1028  ;;  %762 = vst [vmem:[#allocation9 + $0x38] sm:$0xff] %v759_v22  ;;  %v617_v31 = vadd.f32 1.0, %v1027_v24  ;;  %1046 = vtanh.f32 %v587_v21  ;;  %v776_v32 = vadd.f32 %v774_v53, %v648_v25  ;;  %v711_v0 = vmul.f32 0.5, %v695_v4 }
 0x17a   :  { %v1031_v9 = vpop.eup %1030  ;;  %v553_v40 = vmul.f32 0.5, %v537_v26  ;;  %1048 = vtanh.f32 %v666_v20  ;;  %v696_v43 = vadd.f32 1.0, %v1029_v27  ;;  %v490_v15 = vadd.f32 %v1438_v37, %v1326_v58 }
 0x17b   :  { %v1033_v7 = vpop.eup %1032  ;;  %v769_v34 = vmul.f32 %v1031_v9, %v710_v55  ;;  %v633_v42 = vmul.f32 0.5, %v617_v31  ;;  %1050 = vtanh.f32 %v319_v45  ;;  %v667_v63 = vmul.f32 0.5, %v480_v47 }
 0x17c   :  { %v1035_v46 = vpop.eup %1034  ;;  %1052 = vtanh.f32 %v776_v32  ;;  %v775_v10 = vmul.f32 %v766_v5, %v553_v40  ;;  %v509_v2 = vmul.f32 0.5, %v329_v39  ;;  %v589_v3 = vmul.f32 0.5, %v490_v15 }
 0x17d   :  { %772 = vst [vmem:[#allocation9 + $0x40] sm:$0xff] %v769_v34  ;;  %v649_v12 = vmul.f32 %v1033_v7, %v633_v42  ;;  %v538_v49 = vadd.f32 1.0, %v1035_v46  ;;  %1054 = vtanh.f32 %v508_v33  ;;  %v1037_v54 = vpop.eup %1036  ;;  %v486_v52 = vadd.f32 %v1432_v18, %v1330_v60 }
 0x17e   :  { %1056 = vtanh.f32 %v588_v44  ;;  %v618_v62 = vadd.f32 1.0, %v1037_v54  ;;  %v331_v58 = vadd.f32 %v1440_v38, %v1328_v59  ;;  %v712_v14 = vmul.f32 0.5, %v696_v43 }
 0x17f   :  { %v1039_v56 = vpop.eup %1038  ;;  %v777_v61 = vadd.f32 %v775_v10, %v649_v12  ;;  %v554_v23 = vmul.f32 0.5, %v538_v49  ;;  %1058 = vtanh.f32 %v325_v48  ;;  %v668_v29 = vmul.f32 0.5, %v486_v52 }
 0x180   :  { %v1041_v13 = vpop.eup %1040  ;;  %v770_v1 = vmul.f32 %v1039_v56, %v711_v0  ;;  %v634_v30 = vmul.f32 0.5, %v618_v62  ;;  %v492_v20 = vadd.f32 %v1446_v41, %v1330_v60 }
 0x181   :  { %v1043_v28 = vpop.eup %1042  ;;  %1060 = vtanh.f32 %v777_v61  ;;  %v785_v57 = vmul.f32 %v776_v32, %v554_v23  ;;  %v697_v18 = vadd.f32 1.0, %v1041_v13 }
 0x182   :  { %v1045_v5 = vpop.eup %1044  ;;  %773 = vst [vmem:[#allocation9 + $0x48] sm:$0xff] %v770_v1  ;;  %1062 = vtanh.f32 %v509_v2  ;;  %v650_v6 = vmul.f32 %v1043_v28, %v634_v30  ;;  %v669_v27 = vmul.f32 0.5, %v492_v20 }
 0x183   :  { %v1047_v37 = vpop.eup %1046  ;;  %v539_v8 = vadd.f32 1.0, %v1045_v5  ;;  %1064 = vtanh.f32 %v589_v3  ;;  %v713_v4 = vmul.f32 0.5, %v697_v18 }
 0x184   :  { %v1049_v51 = vpop.eup %1048  ;;  %v619_v11 = vadd.f32 1.0, %v1047_v37  ;;  %1066 = vtanh.f32 %v667_v63  ;;  %v787_v16 = vadd.f32 %v785_v57, %v650_v6 }
 0x185   :  { %v1051_v53 = vpop.eup %1050  ;;  %v555_v55 = vmul.f32 0.5, %v539_v8  ;;  %1068 = vtanh.f32 %v331_v58  ;;  %v698_v60 = vadd.f32 1.0, %v1049_v51 }
 0x186   :  { %v1053_v17 = vpop.eup %1052  ;;  %v635_v19 = vmul.f32 0.5, %v619_v11  ;;  %1070 = vtanh.f32 %v787_v16 }
 0x187   :  { %v1055_v59 = vpop.eup %1054  ;;  %v780_v38 = vmul.f32 %v1053_v17, %v712_v14  ;;  %v786_v21 = vmul.f32 %v777_v61, %v555_v55  ;;  %1072 = vtanh.f32 %v668_v29  ;;  %v714_v10 = vmul.f32 0.5, %v698_v60 }
 0x188   :  { %v1057_v36 = vpop.eup %1056  ;;  %v651_v22 = vmul.f32 %v1051_v53, %v635_v19  ;;  %v540_v45 = vadd.f32 1.0, %v1055_v59 }
 0x189   :  { %783 = vst [vmem:[#allocation9 + $0x50] sm:$0xff] %v780_v38  ;;  %v620_v50 = vadd.f32 1.0, %v1057_v36  ;;  %v1059_v24 = vpop.eup %1058 }
 0x18a   :  { %v788_v25 = vadd.f32 %v786_v21, %v651_v22  ;;  %v556_v26 = vmul.f32 0.5, %v540_v45 }
 0x18b   :  { %v1061_v31 = vpop.eup %1060  ;;  %v636_v33 = vmul.f32 0.5, %v620_v50 }
 0x18c   :  { %v1063_v35 = vpop.eup %1062  ;;  %v781_v9 = vmul.f32 %v1061_v31, %v713_v4  ;;  %1074 = vtanh.f32 %v788_v25  ;;  %v796_v41 = vmul.f32 %v787_v16, %v556_v26 }
 0x18d   :  { %v1065_v32 = vpop.eup %1064  ;;  %v652_v40 = vmul.f32 %v1059_v24, %v636_v33  ;;  %v541_v47 = vadd.f32 1.0, %v1063_v35  ;;  %1076 = vtanh.f32 %v669_v27 }
 0x18e   :  { %v1067_v7 = vpop.eup %1066  ;;  %784 = vst [vmem:[#allocation9 + $0x58] sm:$0xff] %v781_v9  ;;  %v621_v34 = vadd.f32 1.0, %v1065_v32 }
 0x18f   :  { %v798_v42 = vadd.f32 %v796_v41, %v652_v40  ;;  %v557_v44 = vmul.f32 0.5, %v541_v47  ;;  %v1069_v46 = vpop.eup %1068  ;;  %v699_v49 = vadd.f32 1.0, %v1067_v7 }
 0x190   :  { %v637_v48 = vmul.f32 0.5, %v621_v34  ;;  %v1071_v12 = vpop.eup %1070 }
 0x191   :  { %1078 = vtanh.f32 %v798_v42  ;;  %812 = vst [vmem:[#allocation10] sm:$0xff] %v798_v42  ;;  %v797_v39 = vmul.f32 %v788_v25, %v557_v44  ;;  %v791_v54 = vmul.f32 %v1071_v12, %v714_v10  ;;  %v1073_v43 = vpop.eup %1072  ;;  %v715_v56 = vmul.f32 0.5, %v699_v49 }
 0x192   :  { %v653_v0 = vmul.f32 %v1069_v46, %v637_v48  ;;  %v700_v23 = vadd.f32 1.0, %v1073_v43 }
 0x193   :  { %794 = vst [vmem:[#allocation9 + $0x60] sm:$0xff] %v791_v54 }
 0x194   :  { %v799_v15 = vadd.f32 %v797_v39, %v653_v0 }
 0x196   :  { %v1075_v61 = vpop.eup %1074  ;;  %1080 = vtanh.f32 %v799_v15  ;;  %813 = vst [vmem:[#allocation10 + $0x8] sm:$0xff] %v799_v15 }
 0x197   :  { %v792_v62 = vmul.f32 %v1075_v61, %v715_v56 }
 0x198   :  { %1159 = shalt.err (!%p1156_p0)
}
 0x199   :  { %s1160_s13 = scalar_lea.hbm %s1513_s5, 256 }
 0x19a   :  { %p1161_p1 = scmp.ne.s32.totalorder %s1513_s5, %s1160_s13  ;;  %p1164_p2 = scmp.lt.u32.totalorder %s1160_s13, %s1513_s5 }
 0x19c   :  { %p1166_p3 = pnand %p1164_p2, %p1161_p1 }
 0x19e   :  { %1169 = shalt.err (!%p1166_p3)
}
 0x19f   :  { %837 = dma.vmem_to_hbm [thread:$0]  %s832_s9, 256, %s1513_s5, [#allocation11], %s1202_s30, %s1202_s30, %s1203_s6   ;;  %v1077_v63 = vpop.eup %1076  ;;  %795 = vst [vmem:[#allocation9 + $0x68] sm:$0xff] %v792_v62  ;;  %v716_v13 = vmul.f32 0.5, %v700_v23 }
 0x1a0   :  { %v1079_v1 = vpop.eup %1078  ;;  %v701_v2 = vadd.f32 1.0, %v1077_v63  ;;  %s1209_s19 = smov [#allocation9]  }
 0x1a1   :  { %v802_v3 = vmul.f32 %v1079_v1, %v716_v13  ;;  %s819_s20 = sshll.u32 %s1209_s19, 4  ;;  %v1081_v57 = vpop.eup %1080  ;;  %s820_s20 = int_to_ptr.vmem [resolvable:$true] %s819_s20 }
 0x1a2   :  { %v717_v28 = vmul.f32 0.5, %v701_v2  ;;  %s1170_s22 = scalar_lea.vmem %s820_s20, 2048  ;;  %p1175_p5 = scmp.lt.s32.totalorder %s820_s20, %s820_s20 }
 0x1a3   :  { %805 = vst [vmem:[#allocation9 + $0x70] sm:$0xff] %v802_v3  ;;  %p1171_p4 = scmp.ne.s32.totalorder %s820_s20, %s1170_s22  ;;  %p1176_p6 = scmp.lt.s32.totalorder %s1170_s22, %s1170_s22 }
 0x1a4   :  { %v803_v30 = vmul.f32 %v1081_v57, %v717_v28 }
 0x1a5   :  { %p1177_p7 = por %p1176_p6, %p1175_p5 }
 0x1a6   :  { %806 = vst [vmem:[#allocation9 + $0x78] sm:$0xff] %v803_v30 }
 0x1a7   :  { %p1178_p8 = pnand %p1177_p7, %p1171_p4 }
 0x1a9   :  { %1181 = shalt.err (!%p1178_p8)
}
 0x1aa   :  { %s1182_s24 = scalar_lea.hbm %s1512_s4, 2048 }
 0x1ab   :  { %p1183_p9 = scmp.ne.s32.totalorder %s1512_s4, %s1182_s24  ;;  %p1186_p10 = scmp.lt.u32.totalorder %s1182_s24, %s1512_s4 }
 0x1ad   :  { %p1188_p11 = pnand %p1186_p10, %p1183_p9 }
 0x1af   :  { %1191 = shalt.err (!%p1188_p11)
}
 0x1b0   :  { %825 = dma.vmem_to_hbm [thread:$0]  %s820_s20, 2048, %s1512_s4, [#allocation5], %s1202_s30, %s1202_s30, %s1203_s6  }
 0x1b1   :  { %1196 = dma.done.wait [#allocation5], 2048  }
 0x1b2   :  { %1197 = vsyncadd [#allocation5], 4294965248 }
 0x1b3   :  { %1198 = dma.done.wait [#allocation11], 256  }
 0x1b4   :  { %1199 = vsyncadd [#allocation11], 4294967040 }
 0x1b5   :  { %844 = vsyncpa [#allocation4], 1 }
 0x1b6   :  { %845 = vsyncpa [#allocation7], 1 }
 0x1b7   :  { %846 = vsyncpa [#allocation5], 1 }
 0x1b8   :  { %847 = vsyncpa [#allocation11], 1 }

</bundles_post_ra>
